<compile_context>
chip_gen: v6e
topology: v6e:2x2x1
jax: 0.10.0
libtpu: 0.0.40
codegen_flags: <defaults>
</compile_context>

<pallas_src>
import jax
import jax.numpy as jnp
import numpy as np
from jax.experimental import pallas as pl
from jax.experimental.pallas import tpu as pltpu

_HIGHEST = jax.lax.Precision.HIGHEST


def _round_up(v, m):
    return (v + m - 1) // m * m


def _device_defaults():
    """(row-block size, scoped-VMEM limit) tuned per TPU generation."""
    try:
        kind = jax.devices()[0].device_kind.lower()
    except Exception:
        kind = ""
    if "v7" in kind or "tpu7" in kind:
        return 1024, 40 * 1024 * 1024          # 64 MiB physical VMEM per TC
    if "v5 lite" in kind or "v5e" in kind or "v6" in kind:
        return 2048, 64 * 1024 * 1024          # 128 MiB physical VMEM
    return 1024, 40 * 1024 * 1024              # conservative default (v4/v5p/unknown)


def _cell_kernel(xw_ref, w1h_ref, w1l_ref, b1_ref, w2_ref, b2_ref,
                 emb_ref, prob_ref, h_acc):
    k = pl.program_id(1)
    nk = pl.num_programs(1)

    xw = xw_ref[...]                                   # (TN, 1024) f32

    # ---- init on the first window element ----
    @pl.when(k == 0)
    def _():
        h_acc[...] = jnp.zeros_like(h_acc)
        emb_ref[...] = xw

    # ---- running max across the K window elements (leading-axis VPU max) ----
    @pl.when(k != 0)
    def _():
        emb_ref[...] = jnp.maximum(emb_ref[...], xw)

    # ---- partial first Linear: sum_k xw[k] @ w1[k] == x @ w1 ----------------
    # f32 contraction as 3 bf16 MXU passes (~= Precision.HIGH, half the passes
    # of HIGHEST) so the MXU never becomes the binding unit on v5e / v7x.
    x_hi = xw.astype(jnp.bfloat16)
    x_lo = (xw - x_hi.astype(jnp.float32)).astype(jnp.bfloat16)
    w_hi = w1h_ref[k]                                  # (1024, H_pad) bf16, VMEM-resident
    w_lo = w1l_ref[k]
    h_acc[...] += (
        jnp.dot(x_hi, w_hi, preferred_element_type=jnp.float32)
        + jnp.dot(x_hi, w_lo, preferred_element_type=jnp.float32)
        + jnp.dot(x_lo, w_hi, preferred_element_type=jnp.float32))

    # ---- finalize router on the last window element ----
    @pl.when(k == nk - 1)
    def _():
        h = jnp.maximum(h_acc[...] + b1_ref[...], 0.0)                 # ReLU
        logits = jnp.dot(h, w2_ref[...],
                         preferred_element_type=jnp.float32,
                         precision=_HIGHEST) + b2_ref[...]
        prob_ref[...] = jnp.maximum(jnp.tanh(logits), 0.0)             # activateFunc


def max_pooling_cell(x, w1, b1, w2, b2, pool_out=1024, tn=None,
                     vmem_limit_bytes=None):
    """x: (B, S, E) float32. Returns (emb (B,S,1024), path_prob (B,S,P))."""
    B, S, E = x.shape
    assert E % pool_out == 0, "only uniform-window adaptive pool supported"
    K = E // pool_out
    N = B * S
    H = w1.shape[1]
    P = w2.shape[1]
    H_pad = _round_up(H, 128)                          # lane-dense hidden accum
    P_pad = _round_up(P, 128)                          # lane-dense prob output

    dflt_tn, dflt_vmem = _device_defaults()
    tn = dflt_tn if tn is None else tn
    vmem_limit_bytes = dflt_vmem if vmem_limit_bytes is None else vmem_limit_bytes

    # Row-block selection: as large as VMEM allows, but keep >= 2 blocks on the
    # "parallel" axis (both v7x TensorCores busy) whenever N is big enough.
    if N >= 512:
        half = _round_up((N + 1) // 2, 256)
        TN = min(tn, half)
    elif N <= tn:
        TN = N
    else:
        TN = tn
    if TN != N:
        TN = max(8, (TN // 8) * 8)
    grid = (pl.cdiv(N, TN), K)

    # ---- one-time wrapper-side rearrangements (see TODO about the x pass) ----
    x_flat = x.reshape(N, E).astype(jnp.float32)
    # xw[k, n, i] = x_flat[n, i*K + k]   (k-th element of pooling window i)
    xw = x_flat.reshape(N, pool_out, K).transpose(2, 0, 1)            # (K, N, 1024)

    # w1k[k, i, :] = w1[i*K + k, :], padded to 128 lanes, split into two bf16
    # slabs for the manual 3-pass f32 matmul.  Both slabs stay VMEM-resident.
    w1k = w1.reshape(pool_out, K, H).transpose(1, 0, 2)               # (K, 1024, H)
    w1kp = jnp.zeros((K, pool_out, H_pad), jnp.float32).at[:, :, :H].set(w1k)
    w1_hi = w1kp.astype(jnp.bfloat16)
    w1_lo = (w1kp - w1_hi.astype(jnp.float32)).astype(jnp.bfloat16)

    b1p = jnp.zeros((1, H_pad), jnp.float32).at[:, :H].set(b1.reshape(1, H))
    w2p = jnp.zeros((H_pad, P_pad), jnp.float32).at[:H, :P].set(w2)
    b2p = jnp.zeros((1, P_pad), jnp.float32).at[:, :P].set(b2.reshape(1, P))

    emb_flat, prob_pad = pl.pallas_call(
        _cell_kernel,
        out_shape=(
            jax.ShapeDtypeStruct((N, pool_out), jnp.float32),
            jax.ShapeDtypeStruct((N, P_pad), jnp.float32),
        ),
        grid_spec=pltpu.PrefetchScalarGridSpec(
            num_scalar_prefetch=0,
            grid=grid,
            in_specs=[
                pl.BlockSpec((None, TN, pool_out), lambda i, k: (k, i, 0)),   # xw
                pl.BlockSpec((K, pool_out, H_pad), lambda i, k: (0, 0, 0)),   # w1_hi (resident)
                pl.BlockSpec((K, pool_out, H_pad), lambda i, k: (0, 0, 0)),   # w1_lo (resident)
                pl.BlockSpec((1, H_pad), lambda i, k: (0, 0)),                # b1 (padded)
                pl.BlockSpec((H_pad, P_pad), lambda i, k: (0, 0)),            # w2 (padded)
                pl.BlockSpec((1, P_pad), lambda i, k: (0, 0)),                # b2 (padded)
            ],
            out_specs=(
                pl.BlockSpec((TN, pool_out), lambda i, k: (i, 0)),            # emb
                pl.BlockSpec((TN, P_pad), lambda i, k: (i, 0)),               # prob
            ),
            scratch_shapes=[pltpu.VMEM((TN, H_pad), jnp.float32)],            # h accum
        ),
        compiler_params=pltpu.CompilerParams(
            dimension_semantics=("parallel", "arbitrary"),
            vmem_limit_bytes=vmem_limit_bytes,
        ),
    )(xw, w1_hi, w1_lo, b1p, w2p, b2p)

    emb = emb_flat.reshape(B, S, pool_out)
    path_prob = prob_pad[:, :P].reshape(B, S, P)
    return emb, path_prob


if __name__ == "__main__":
    # Small shapes consistent with the module.  embed_size must be a multiple
    # of 1024 for the AdaptiveMaxPool1d(1024) fast path; use 2048 (window=2).
    B, S = 2, 8
    embed_size = 2048
    hid_router = 32
    num_out_path = 4

    key = jax.random.PRNGKey(0)
    kx, kw1, kb1, kw2, kx2 = jax.random.split(key, 5)

    x = jax.random.normal(kx, (B, S, embed_size), dtype=jnp.float32)

    # Deterministic synthetic parameters (Linear weights stored as (in, out)).
    w1 = jax.random.normal(kw1, (embed_size, hid_router), dtype=jnp.float32) * 0.02
    b1 = jax.random.normal(kb1, (hid_router,), dtype=jnp.float32) * 0.02
    w2 = jax.random.normal(kw2, (hid_router, num_out_path), dtype=jnp.float32) * 0.02
    b2 = jnp.full((num_out_path,), 1.5, dtype=jnp.float32)  # init_weights(): bias = 1.5

    def ref_fn(xr):
        # Pure-JAX reference (same semantics as the PyTorch forward).
        h = jnp.maximum(jnp.dot(xr, w1, precision=_HIGHEST) + b1, 0.0)
        prob = jnp.maximum(jnp.tanh(jnp.dot(h, w2, precision=_HIGHEST) + b2), 0.0)
        Br, Sr, Er = xr.shape
        emb = jnp.max(xr.reshape(Br, Sr, 1024, Er // 1024), axis=-1)
        return emb, prob

    # ---- main path ----
    emb, path_prob = max_pooling_cell(x, w1, b1, w2, b2)
    jax.block_until_ready((emb, path_prob))
    emb_ref, prob_ref = ref_fn(x)
    assert emb.shape == (B, S, 1024) and path_prob.shape == (B, S, num_out_path)
    np.testing.assert_allclose(np.asarray(emb), np.asarray(emb_ref), atol=1e-5)
    np.testing.assert_allclose(np.asarray(path_prob), np.asarray(prob_ref),
                               atol=1e-4, rtol=1e-4)

    # ---- ragged-N / multi-row-block path (N % TN != 0), per review ----
    x2 = jax.random.normal(kx2, (2, 9, embed_size), dtype=jnp.float32)   # N = 18
    emb2, prob2 = max_pooling_cell(x2, w1, b1, w2, b2, tn=8)             # blocks 8,8,2
    jax.block_until_ready((emb2, prob2))
    emb2_ref, prob2_ref = ref_fn(x2)
    np.testing.assert_allclose(np.asarray(emb2), np.asarray(emb2_ref), atol=1e-5)
    np.testing.assert_allclose(np.asarray(prob2), np.asarray(prob2_ref),
                               atol=1e-4, rtol=1e-4)

    print("KERNEL_OK")
</pallas_src>

<mosaic_0001>
module attributes {stable_mosaic.version = 11 : i64} {
  func.func @_cell_kernel(%arg0: i32, %arg1: i32, %arg2: memref<1x16x1024xf32, #tpu.memory_space<vmem>>, %arg3: memref<2x1024x128xbf16, #tpu.memory_space<vmem>>, %arg4: memref<2x1024x128xbf16, #tpu.memory_space<vmem>>, %arg5: memref<1x128xf32, #tpu.memory_space<vmem>>, %arg6: memref<128x128xf32, #tpu.memory_space<vmem>>, %arg7: memref<1x128xf32, #tpu.memory_space<vmem>>, %arg8: memref<16x1024xf32, #tpu.memory_space<vmem>>, %arg9: memref<16x128xf32, #tpu.memory_space<vmem>>, %arg10: memref<16x128xf32, #tpu.memory_space<vmem>>) attributes {dimension_semantics = [#tpu.dimension_semantics<parallel>, #tpu.dimension_semantics<arbitrary>], iteration_bounds = array<i64: 1, 2>, scalar_prefetch = 0 : i64, scratch_operands = 1 : i64, tpu.core_type = #tpu.core_type<tc>, window_params = [{transform_indices = @transform_0, window_bounds = array<i64: 1, 16, 1024>}, {pipeline_mode = #tpu.pipeline_mode<synchronous>, transform_indices = @transform_1, window_bounds = array<i64: 2, 1024, 128>}, {pipeline_mode = #tpu.pipeline_mode<synchronous>, transform_indices = @transform_2, window_bounds = array<i64: 2, 1024, 128>}, {pipeline_mode = #tpu.pipeline_mode<synchronous>, transform_indices = @transform_3, window_bounds = array<i64: 1, 128>}, {pipeline_mode = #tpu.pipeline_mode<synchronous>, transform_indices = @transform_4, window_bounds = array<i64: 128, 128>}, {pipeline_mode = #tpu.pipeline_mode<synchronous>, transform_indices = @transform_5, window_bounds = array<i64: 1, 128>}, {transform_indices = @transform_6, window_bounds = array<i64: 16, 1024>}, {transform_indices = @transform_7, window_bounds = array<i64: 16, 128>}]} {
    %c0 = arith.constant 0 : index
    %c0_0 = arith.constant 0 : index
    %c0_1 = arith.constant 0 : index
    %0 = vector.load %arg2[%c0, %c0_0, %c0_1] : memref<1x16x1024xf32, #tpu.memory_space<vmem>>, vector<1x16x1024xf32>
    %1 = vector.shape_cast %0 : vector<1x16x1024xf32> to vector<16x1024xf32>
    %c0_i32 = arith.constant 0 : i32
    %2 = arith.cmpi eq, %arg1, %c0_i32 : i32
    %3 = arith.extui %2 : i1 to i32
    %c0_i32_2 = arith.constant 0 : i32
    %4 = arith.cmpi ne, %3, %c0_i32_2 : i32
    scf.if %4 {
      %cst_16 = arith.constant 0.000000e+00 : f32
      %29 = vector.broadcast %cst_16 : f32 to vector<16x128xf32>
      %c0_17 = arith.constant 0 : index
      %c0_18 = arith.constant 0 : index
      %30 = vector.load %arg10[%c0_17, %c0_18] : memref<16x128xf32, #tpu.memory_space<vmem>>, vector<16x128xf32>
      tpu.vector_store %arg10[%c0_17, %c0_18], %29 {strides = array<i32>} : memref<16x128xf32, #tpu.memory_space<vmem>>, vector<16x128xf32>,
      %c0_19 = arith.constant 0 : index
      %c0_20 = arith.constant 0 : index
      %31 = vector.load %arg8[%c0_19, %c0_20] : memref<16x1024xf32, #tpu.memory_space<vmem>>, vector<16x1024xf32>
      tpu.vector_store %arg8[%c0_19, %c0_20], %1 {strides = array<i32>} : memref<16x1024xf32, #tpu.memory_space<vmem>>, vector<16x1024xf32>,
    } else {
    }
    %c0_i32_3 = arith.constant 0 : i32
    %5 = arith.cmpi ne, %arg1, %c0_i32_3 : i32
    %6 = arith.extui %5 : i1 to i32
    %c0_i32_4 = arith.constant 0 : i32
    %7 = arith.cmpi ne, %6, %c0_i32_4 : i32
    scf.if %7 {
      %c0_16 = arith.constant 0 : index
      %c0_17 = arith.constant 0 : index
      %29 = vector.load %arg8[%c0_16, %c0_17] : memref<16x1024xf32, #tpu.memory_space<vmem>>, vector<16x1024xf32>
      %30 = arith.maximumf %29, %1 : vector<16x1024xf32>
      %c0_18 = arith.constant 0 : index
      %c0_19 = arith.constant 0 : index
      %31 = vector.load %arg8[%c0_18, %c0_19] : memref<16x1024xf32, #tpu.memory_space<vmem>>, vector<16x1024xf32>
      tpu.vector_store %arg8[%c0_18, %c0_19], %30 {strides = array<i32>} : memref<16x1024xf32, #tpu.memory_space<vmem>>, vector<16x1024xf32>,
    } else {
    }
    %8 = arith.truncf %1 : vector<16x1024xf32> to vector<16x1024xbf16>
    %9 = arith.extf %8 : vector<16x1024xbf16> to vector<16x1024xf32>
    %10 = arith.subf %1, %9 : vector<16x1024xf32>
    %11 = arith.truncf %10 : vector<16x1024xf32> to vector<16x1024xbf16>
    %12 = arith.index_cast %arg1 : i32 to index
    %c0_5 = arith.constant 0 : index
    %c0_6 = arith.constant 0 : index
    %13 = vector.load %arg3[%12, %c0_5, %c0_6] : memref<2x1024x128xbf16, #tpu.memory_space<vmem>>, vector<1x1024x128xbf16>
    %14 = vector.shape_cast %13 : vector<1x1024x128xbf16> to vector<1024x128xbf16>
    %15 = arith.index_cast %arg1 : i32 to index
    %c0_7 = arith.constant 0 : index
    %c0_8 = arith.constant 0 : index
    %16 = vector.load %arg4[%15, %c0_7, %c0_8] : memref<2x1024x128xbf16, #tpu.memory_space<vmem>>, vector<1x1024x128xbf16>
    %17 = vector.shape_cast %16 : vector<1x1024x128xbf16> to vector<1024x128xbf16>
    %c0_9 = arith.constant 0 : index
    %c0_10 = arith.constant 0 : index
    %18 = vector.load %arg10[%c0_9, %c0_10] : memref<16x128xf32, #tpu.memory_space<vmem>>, vector<16x128xf32>
    %cst = arith.constant dense<0.000000e+00> : vector<16x128xf32>
    %19 = tpu.matmul %8, %14, %cst {dimension_numbers = #tpu.dot_dimension_numbers<[1], [0], [0], [1], [0, 0, 1, 1], [], []>} : vector<16x1024xbf16>, vector<1024x128xbf16>, vector<16x128xf32> -> vector<16x128xf32>
    %cst_11 = arith.constant dense<0.000000e+00> : vector<16x128xf32>
    %20 = tpu.matmul %8, %17, %cst_11 {dimension_numbers = #tpu.dot_dimension_numbers<[1], [0], [0], [1], [0, 0, 1, 1], [], []>} : vector<16x1024xbf16>, vector<1024x128xbf16>, vector<16x128xf32> -> vector<16x128xf32>
    %21 = arith.addf %19, %20 : vector<16x128xf32>
    %cst_12 = arith.constant dense<0.000000e+00> : vector<16x128xf32>
    %22 = tpu.matmul %11, %14, %cst_12 {dimension_numbers = #tpu.dot_dimension_numbers<[1], [0], [0], [1], [0, 0, 1, 1], [], []>} : vector<16x1024xbf16>, vector<1024x128xbf16>, vector<16x128xf32> -> vector<16x128xf32>
    %23 = arith.addf %21, %22 : vector<16x128xf32>
    %24 = arith.addf %18, %23 : vector<16x128xf32>
    %c0_13 = arith.constant 0 : index
    %c0_14 = arith.constant 0 : index
    %25 = vector.load %arg10[%c0_13, %c0_14] : memref<16x128xf32, #tpu.memory_space<vmem>>, vector<16x128xf32>
    tpu.vector_store %arg10[%c0_13, %c0_14], %24 {strides = array<i32>} : memref<16x128xf32, #tpu.memory_space<vmem>>, vector<16x128xf32>,
    %c1_i32 = arith.constant 1 : i32
    %26 = arith.cmpi eq, %arg1, %c1_i32 : i32
    %27 = arith.extui %26 : i1 to i32
    %c0_i32_15 = arith.constant 0 : i32
    %28 = arith.cmpi ne, %27, %c0_i32_15 : i32
    scf.if %28 {
      %c0_16 = arith.constant 0 : index
      %c0_17 = arith.constant 0 : index
      %29 = vector.load %arg10[%c0_16, %c0_17] : memref<16x128xf32, #tpu.memory_space<vmem>>, vector<16x128xf32>
      %c0_18 = arith.constant 0 : index
      %c0_19 = arith.constant 0 : index
      %30 = vector.load %arg5[%c0_18, %c0_19] : memref<1x128xf32, #tpu.memory_space<vmem>>, vector<1x128xf32>
      %31 = vector.broadcast %30 : vector<1x128xf32> to vector<16x128xf32>
      %32 = arith.addf %29, %31 : vector<16x128xf32>
      %cst_20 = arith.constant 0.000000e+00 : f32
      %33 = vector.broadcast %cst_20 : f32 to vector<16x128xf32>
      %34 = arith.maximumf %32, %33 : vector<16x128xf32>
      %c0_21 = arith.constant 0 : index
      %c0_22 = arith.constant 0 : index
      %35 = vector.load %arg6[%c0_21, %c0_22] : memref<128x128xf32, #tpu.memory_space<vmem>>, vector<128x128xf32>
      %cst_23 = arith.constant dense<0.000000e+00> : vector<16x128xf32>
      %36 = tpu.matmul %34, %35, %cst_23 {dimension_numbers = #tpu.dot_dimension_numbers<[1], [0], [0], [1], [0, 0, 1, 1], [], []>, precision = #tpu.contract_precision<fp32>} : vector<16x128xf32>, vector<128x128xf32>, vector<16x128xf32> -> vector<16x128xf32>
      %c0_24 = arith.constant 0 : index
      %c0_25 = arith.constant 0 : index
      %37 = vector.load %arg7[%c0_24, %c0_25] : memref<1x128xf32, #tpu.memory_space<vmem>>, vector<1x128xf32>
      %38 = vector.broadcast %37 : vector<1x128xf32> to vector<16x128xf32>
      %39 = arith.addf %36, %38 : vector<16x128xf32>
      %40 = math.tanh %39 : vector<16x128xf32>
      %cst_26 = arith.constant 0.000000e+00 : f32
      %41 = vector.broadcast %cst_26 : f32 to vector<16x128xf32>
      %42 = arith.maximumf %40, %41 : vector<16x128xf32>
      %c0_27 = arith.constant 0 : index
      %c0_28 = arith.constant 0 : index
      %43 = vector.load %arg9[%c0_27, %c0_28] : memref<16x128xf32, #tpu.memory_space<vmem>>, vector<16x128xf32>
      tpu.vector_store %arg9[%c0_27, %c0_28], %42 {strides = array<i32>} : memref<16x128xf32, #tpu.memory_space<vmem>>, vector<16x128xf32>,
    } else {
    }
    return
  }
  func.func @transform_0(%arg0: i32, %arg1: i32) -> (i32, i32, i32) {
    %c0_i32 = arith.constant 0 : i32
    %c0_i32_0 = arith.constant 0 : i32
    return %arg1, %arg0, %c0_i32 : i32, i32, i32
  }
  func.func @transform_1(%arg0: i32, %arg1: i32) -> (i32, i32, i32) {
    %c0_i32 = arith.constant 0 : i32
    %c0_i32_0 = arith.constant 0 : i32
    %c0_i32_1 = arith.constant 0 : i32
    %c0_i32_2 = arith.constant 0 : i32
    return %c0_i32, %c0_i32_0, %c0_i32_1 : i32, i32, i32
  }
  func.func @transform_2(%arg0: i32, %arg1: i32) -> (i32, i32, i32) {
    %c0_i32 = arith.constant 0 : i32
    %c0_i32_0 = arith.constant 0 : i32
    %c0_i32_1 = arith.constant 0 : i32
    %c0_i32_2 = arith.constant 0 : i32
    return %c0_i32, %c0_i32_0, %c0_i32_1 : i32, i32, i32
  }
  func.func @transform_3(%arg0: i32, %arg1: i32) -> (i32, i32) {
    %c0_i32 = arith.constant 0 : i32
    %c0_i32_0 = arith.constant 0 : i32
    %c0_i32_1 = arith.constant 0 : i32
    return %c0_i32, %c0_i32_0 : i32, i32
  }
  func.func @transform_4(%arg0: i32, %arg1: i32) -> (i32, i32) {
    %c0_i32 = arith.constant 0 : i32
    %c0_i32_0 = arith.constant 0 : i32
    %c0_i32_1 = arith.constant 0 : i32
    return %c0_i32, %c0_i32_0 : i32, i32
  }
  func.func @transform_5(%arg0: i32, %arg1: i32) -> (i32, i32) {
    %c0_i32 = arith.constant 0 : i32
    %c0_i32_0 = arith.constant 0 : i32
    %c0_i32_1 = arith.constant 0 : i32
    return %c0_i32, %c0_i32_0 : i32, i32
  }
  func.func @transform_6(%arg0: i32, %arg1: i32) -> (i32, i32) {
    %c0_i32 = arith.constant 0 : i32
    %c0_i32_0 = arith.constant 0 : i32
    return %arg0, %c0_i32 : i32, i32
  }
  func.func @transform_7(%arg0: i32, %arg1: i32) -> (i32, i32) {
    %c0_i32 = arith.constant 0 : i32
    %c0_i32_0 = arith.constant 0 : i32
    return %arg0, %c0_i32 : i32, i32
  }
}

</mosaic_0001>

<bundles_post_ra>
// kernel: tpu_custom_call.1
= control target key start
LH: loop header
LB: loop body
LE: loop exit
PB: predicated region body
PF: predicated region fallthrough
CT: control target
= control target key end

     0   :  { %13 = vsyncpa [#allocation4], 0  ;;  %s5228_s0 = inlined_call_operand.hbm [shape: f32[2,16,1024], index: 0, kind: input, shape index: {}]   ;;  %s5229_s1 = inlined_call_operand.hbm [shape: bf16[2,1024,128], index: 1, kind: input, shape index: {}]   ;;  %s5230_s2 = inlined_call_operand.hbm [shape: bf16[2,1024,128], index: 2, kind: input, shape index: {}]   ;;  %s5231_s3 = inlined_call_operand.vmem [shape: f32[1,128], index: 3, kind: input, shape index: {}]   ;;  %s5232_s4 = inlined_call_operand.hbm [shape: f32[128,128], index: 4, kind: input, shape index: {}]   ;;  %s5233_s5 = inlined_call_operand.vmem [shape: f32[1,128], index: 5, kind: input, shape index: {}]   ;;  %s5234_s6 = inlined_call_operand.hbm [shape: f32[16,1024], index: 6, kind: output, shape index: {0}]   ;;  %s5235_s7 = inlined_call_operand.hbm [shape: f32[16,128], index: 7, kind: output, shape index: {1}]  }
   0x1   :  { %15 = vsyncpa [#allocation4 + $0x1], 0 }
   0x2   :  { %16 = vsyncpa [#allocation7], 0 }
   0x3   :  { %17 = vsyncpa [#allocation10], 0 }
   0x4   :  { %18 = vsyncpa [#allocation5], 0 }
   0x5   :  { %19 = vsyncpa [#allocation13], 0  ;;  %s4156_s24 = smov 0   ;;  %s4158_s25 = smov 0  }
   0x6   :  { %s4160_s26 = smov 0   ;;  %s4162_s27 = smov 0  }
   0x7   :  { %s4164_s28 = smov 0   ;;  %s4166_s29 = smov 0  }
   0x8 LB: > { %s5236_s30 = sadd.s32 4294967295, %s4098_s29   ;;  %p59_p0 = scmp.ne.s32.totalorder %s4082_s25, %s4078_s24  ;;  %s4098_s29 = sphi %s4166_s29, %s25_s29   ;;  %s4094_s28 = sphi %s4164_s28, %s5345_s28   ;;  %s4090_s27 = sphi %s4162_s27, %s5344_s27   ;;  %s4086_s26 = sphi %s4160_s26, %s5343_s26   ;;  %s4082_s25 = sphi %s4158_s25, %s5342_s25   ;;  %s4078_s24 = sphi %s4156_s24, %s5341_s24  }
   0x9   : > { %p4188_p1 = scmp.eq.s32.totalorder %s5236_s30, 0  ;;  %p2896_p2 = scmp.ge.s32.totalorder %s4098_s29, 1 }
   0xa   : > { %p227_p3 = scmp.lt.s32.totalorder %s4098_s29, 3  ;;  %s4100_s11 = smov [#allocation6]  }
   0xb   : > { %p4196_p4 = por %p4188_p1, %p59_p0  ;;  %s239_s12 = sshll.u32 %s4100_s11, 4  ;;  %s240_s12 = int_to_ptr.vmem [resolvable:$true] %s239_s12 }
   0xc   : > { %p4200_p5 = pnand %p2896_p2, %p227_p3  ;;  %s4101_s14 = smov [#allocation8]  }
   0xd   : > { %s252_s15 = sshll.u32 %s4101_s14, 4  ;;  %s4102_s16 = smov [#allocation9]   ;;  %s253_s15 = int_to_ptr.vmem [resolvable:$true] %s252_s15 }
   0xe   : > { %p3658_p6 = pneg %p4200_p5  ;;  %s268_s17 = sshll.u32 %s4102_s16, 4  ;;  %s269_s17 = int_to_ptr.vmem [resolvable:$true] %s268_s17 }
   0xf   : > { %s3889_s18 = scalar_lea.vmem %s240_s12, 16384  ;;  %p3897_p12 = scmp.lt.s32.totalorder %s240_s12, %s240_s12 }
  0x10   : > { %p4208_p7 = pnand %p3658_p6, %p4188_p1  ;;  %p3890_p9 = scmp.ne.s32.totalorder %s240_s12, %s3889_s18 }
  0x11   : > { %p3898_p13 = scmp.lt.s32.totalorder %s3889_s18, %s3889_s18 }
  0x12   : > { %p3880_p8 = pneg %p4208_p7 }
  0x13   : > { %p3899_p0 = por %p3898_p13, %p3897_p12 }
  0x14   : > { %p3892_p10 = pnand %p3890_p9, %p3880_p8 }
  0x16   : > { %p3893_p11 = pneg %p3892_p10 }
  0x18   : > { %p3900_p2 = pnand %p3899_p0, %p3893_p11 }
  0x1a   : > { %3903 = shalt.err (!%p3900_p2)
}
  0x1b   : > { %s4103_s19 = smov 64   ;;  %s4104_s20 = smov 4  }
  0x1c   : > { %3661 = dma.hbm_to_vmem [thread:$0]  (!%p4208_p7), %s5229_s1, 16384, %s240_s12, [#allocation7], %s4103_s19, %s4103_s19, %s4104_s20  }
  0x1d   : > { %s3915_s23 = scalar_lea.vmem %s253_s15, 16384  ;;  %p3923_p10 = scmp.lt.s32.totalorder %s253_s15, %s253_s15 }
  0x1e   : > { %p3916_p3 = scmp.ne.s32.totalorder %s253_s15, %s3915_s23  ;;  %p3924_p11 = scmp.lt.s32.totalorder %s3915_s23, %s3915_s23 }
  0x20   : > { %p3918_p6 = pnand %p3916_p3, %p3880_p8  ;;  %p3925_p12 = por %p3924_p11, %p3923_p10 }
  0x22   : > { %p3919_p9 = pneg %p3918_p6 }
  0x24   : > { %p3926_p13 = pnand %p3925_p12, %p3919_p9 }
  0x26   : > { %3929 = shalt.err (!%p3926_p13)
}
  0x27   : > { %3664 = dma.hbm_to_vmem [thread:$0]  (!%p4208_p7), %s5230_s2, 16384, %s253_s15, [#allocation7], %s4103_s19, %s4103_s19, %s4104_s20  }
  0x28   : > { %s3941_s12 = scalar_lea.vmem %s269_s17, 2048  ;;  %p3949_p6 = scmp.lt.s32.totalorder %s269_s17, %s269_s17 }
  0x29   : > { %p3942_p0 = scmp.ne.s32.totalorder %s269_s17, %s3941_s12  ;;  %p3950_p10 = scmp.lt.s32.totalorder %s3941_s12, %s3941_s12 }
  0x2b   : > { %p3944_p2 = pnand %p3942_p0, %p3880_p8  ;;  %p3951_p9 = por %p3950_p10, %p3949_p6 }
  0x2d   : > { %p3945_p3 = pneg %p3944_p2 }
  0x2f   : > { %p3952_p11 = pnand %p3951_p9, %p3945_p3 }
  0x31   : > { %3955 = shalt.err (!%p3952_p11)
}
  0x32   : > { %s4105_s14 = smov 128   ;;  %s4106_s15 = smov 8  }
  0x33   : > { %3667 = dma.hbm_to_vmem [thread:$0]  (!%p4208_p7), %s5232_s4, 2048, %s269_s17, [#allocation10], %s4105_s14, %s4105_s14, %s4106_s15  }
  0x34   : > { %s46_s20 = sadd.s32 1, %s4086_s26  ;;  %s34_s21 = sadd.s32 1, %s4094_s28 }
  0x35   : > { %p53_p8 = scmp.ne.s32.totalorder %s4086_s26, %s4082_s25  ;;  %p35_p12 = scmp.ge.s32.totalorder %s34_s21, 2 }
  0x36   : > { %p54_p13 = scmp.eq.s32.totalorder %s4098_s29, 0  ;;  %p3675_p0 = scmp.lt.s32.totalorder %s4098_s29, 2 }
  0x37   : > { %s285_s22 = sand.u32 1, %s4086_s26   ;;  %s5347_s21 = smov (%p35_p12, %s34_s21), 0 }
  0x38   : > { %p55_p2 = por %p54_p13, %p53_p8  ;;  %s41_s23 = ssub.s32 %s4094_s28, %s5347_s21 }
  0x39   : > { %s2901_s24 = sshll.u32 %s285_s22, 7  ;;  %p44_p3 = scmp.eq.s32.totalorder %s41_s23, 0 }
  0x3a   : > { %s3051_s13 = sshll.u32 %s4094_s28, 11  ;;  %s289_s11 = scalar_lea.vmem [#allocation3], %s2901_s24 }
  0x3b   : > { %s299_s12 = sshll.u32 %s289_s11, 4  ;;  %s298_s16 = scalar_lea.hbm %s5228_s0, %s3051_s13  ;;  %s300_s12 = int_to_ptr.vmem [resolvable:$true] %s299_s12 }
  0x3c   : > { %s4255_s17 = scalar_select %p44_p3, %s4086_s26, %s46_s20  }
  0x3d   : > { %p4262_p7 = pnand %p3675_p0, %p55_p2  ;;  %s286_s30 = scalar_lea.sflag [#allocation4], %s285_s22 }
  0x3e   : > { %s3969_s23 = scalar_lea.vmem %s300_s12, 2048  ;;  %s4107_s20 = smov [#allocation3]  }
  0x3f   : > { %p3958_p6 = pneg %p4262_p7  ;;  %p3970_p10 = scmp.ne.s32.totalorder %s300_s12, %s3969_s23 }
  0x40   : > { %s3974_s24 = sshll.u32 %s4107_s20, 4  ;;  %s3975_s24 = int_to_ptr.vmem [resolvable:$false] %s3974_s24 }
  0x41   : > { %p3972_p9 = pnand %p3970_p10, %p3958_p6  ;;  %s3976_s11 = scalar_lea.vmem %s3975_s24, 4096 }
  0x42   : > { %p3977_p8 = scmp.lt.s32.totalorder %s300_s12, %s3975_s24  ;;  %p3978_p12 = scmp.lt.s32.totalorder %s3976_s11, %s3969_s23 }
  0x43   : > { %p3973_p11 = pneg %p3972_p9 }
  0x44   : > { %p3979_p13 = por %p3978_p12, %p3977_p8 }
  0x46   : > { %p3980_p3 = pnand %p3979_p13, %p3973_p11 }
  0x48   : > { %3983 = shalt.err (!%p3980_p3)
}
  0x49   : > { %s4108_s13 = smov 1024   ;;  %311 = sbr.rel (%p4200_p5) target bundleno = 884 (0x374), region = 44 }
  0x4a   : > { %3671 = dma.hbm_to_vmem [thread:$0]  (!%p4262_p7), %s298_s16, 2048, %s300_s12, %s286_s30, %s4108_s13, %s4108_s13, %s4103_s19  }
  0x4e   : > { %s313_s22 = sand.u32 1, %s4082_s25  }
  0x4f   : > { %s2905_s14 = sshll.u32 %s313_s22, 7  ;;  %s314_s15 = scalar_lea.sflag [#allocation4], %s313_s22 }
  0x50   : > { %s317_s20 = scalar_lea.vmem [#allocation3], %s2905_s14 }
  0x51   : > { %4057 = dma.done.wait (%p4196_p4), %s314_s15, 2048  }
  0x52   : > { %4059 = vsyncadd (%p4196_p4), %s314_s15, 4294965248 }
  0x53   : > { %4061 = dma.done.wait (%p4188_p1), [#allocation7], 32768  }
  0x54   : > { %4063 = vsyncadd (%p4188_p1), [#allocation7], 4294934528 }
  0x55   : > { %4065 = dma.done.wait (%p4188_p1), [#allocation10], 2048  }
  0x56   : > { %4067 = vsyncadd (%p4188_p1), [#allocation10], 4294965248  ;;  %v4286_v0 = vld [vmem:[%s317_s20] sm:$0xff]  ;;  %v4288_v1 = vld [vmem:[%s317_s20 + $0x8] sm:$0xff]  ;;  %p2909_p1 = scmp.ne.s32.totalorder %s4090_s27, 0 }
  0x57   : > { %v4290_v2 = vld [vmem:[%s317_s20 + $0x10] sm:$0xff]  ;;  %v4292_v3 = vld [vmem:[%s317_s20 + $0x18] sm:$0xff]  ;;  %v4294_v4 = vld [vmem:[%s317_s20 + $0x20] sm:$0xff] }
  0x58   : > { %5275 = vst [vmem:[#allocation19_spill] sm:$0xff] %v4294_v4  ;;  %v4296_v5 = vld [vmem:[%s317_s20 + $0x28] sm:$0xff]  ;;  %v4298_v6 = vld [vmem:[%s317_s20 + $0x30] sm:$0xff]  ;;  %v4300_v7 = vld [vmem:[%s317_s20 + $0x38] sm:$0xff]  ;;  %378 = sbr.rel (%p2909_p1) target bundleno = 102 (0x66), region = 64 }
  0x59   : > { %5276 = vst [vmem:[#allocation20_spill] sm:$0xff] %v4298_v6  ;;  %v4302_v8 = vld [vmem:[%s317_s20 + $0x40] sm:$0xff]  ;;  %v4304_v9 = vld [vmem:[%s317_s20 + $0x48] sm:$0xff]  ;;  %v4306_v10 = vld [vmem:[%s317_s20 + $0x50] sm:$0xff] }
  0x5a   : > { %v4308_v11 = vld [vmem:[%s317_s20 + $0x58] sm:$0xff]  ;;  %v4310_v12 = vld [vmem:[%s317_s20 + $0x60] sm:$0xff]  ;;  %v4312_v13 = vld [vmem:[%s317_s20 + $0x68] sm:$0xff] }
  0x5b   : > { %5277 = vst [vmem:[#allocation21_spill] sm:$0xff] %v4310_v12  ;;  %v4314_v14 = vld [vmem:[%s317_s20 + $0x70] sm:$0xff]  ;;  %v4316_v15 = vld [vmem:[%s317_s20 + $0x78] sm:$0xff] }
  0x5c   : > { %5278 = vst [vmem:[#allocation22_spill] sm:$0xff] %v4314_v14 }
  0x5d   : > { %381 = vst [vmem:[#allocation11] sm:$0xff] %v4286_v0  ;;  %382 = vst [vmem:[#allocation11 + $0x8] sm:$0xff] %v4288_v1  ;;  %v4109_v16 = vmov 0.0  }
  0x5e   : > { %383 = vst [vmem:[#allocation11 + $0x10] sm:$0xff] %v4290_v2  ;;  %384 = vst [vmem:[#allocation11 + $0x18] sm:$0xff] %v4292_v3 }
  0x5f   : > { %385 = vst [vmem:[#allocation11 + $0x20] sm:$0xff] %v4294_v4  ;;  %386 = vst [vmem:[#allocation11 + $0x28] sm:$0xff] %v4296_v5 }
  0x60   : > { %387 = vst [vmem:[#allocation11 + $0x30] sm:$0xff] %v4298_v6  ;;  %388 = vst [vmem:[#allocation11 + $0x38] sm:$0xff] %v4300_v7 }
  0x61   : > { %389 = vst [vmem:[#allocation11 + $0x40] sm:$0xff] %v4302_v8  ;;  %390 = vst [vmem:[#allocation11 + $0x48] sm:$0xff] %v4304_v9 }
  0x62   : > { %391 = vst [vmem:[#allocation11 + $0x50] sm:$0xff] %v4306_v10  ;;  %392 = vst [vmem:[#allocation11 + $0x58] sm:$0xff] %v4308_v11 }
  0x63   : > { %393 = vst [vmem:[#allocation11 + $0x60] sm:$0xff] %v4310_v12  ;;  %394 = vst [vmem:[#allocation11 + $0x68] sm:$0xff] %v4312_v13 }
  0x64   : > { %395 = vst [vmem:[#allocation11 + $0x70] sm:$0xff] %v4314_v14  ;;  %396 = vst [vmem:[#allocation11 + $0x78] sm:$0xff] %v4316_v15 }
  0x65   : > { %379 = vst [vmem:[#allocation2] sm:$0xff] %v4109_v16  ;;  %380 = vst [vmem:[#allocation2 + $0x8] sm:$0xff] %v4109_v16 }
  0x66 PF: > { %p2910_p4 = scmp.eq.s32.totalorder %s4090_s27, 0 }
  0x68   : > { %400 = sbr.rel (%p2910_p4) target bundleno = 120 (0x78), region = 68 }
  0x6d   : > { %v401_v17 = vld [vmem:[#allocation11] sm:$0xff]  ;;  %v402_v18 = vld [vmem:[#allocation11 + $0x8] sm:$0xff]  ;;  %v403_v19 = vld [vmem:[#allocation11 + $0x10] sm:$0xff] }
  0x6e   : > { %v417_v20 = vmax.f32 %v401_v17, %v4286_v0  ;;  %v418_v21 = vmax.f32 %v402_v18, %v4288_v1  ;;  %v419_v22 = vmax.f32 %v403_v19, %v4290_v2  ;;  %v404_v23 = vld [vmem:[#allocation11 + $0x18] sm:$0xff]  ;;  %v405_v24 = vld [vmem:[#allocation11 + $0x20] sm:$0xff]  ;;  %v406_v25 = vld [vmem:[#allocation11 + $0x28] sm:$0xff] }
  0x6f   : > { %v420_v26 = vmax.f32 %v404_v23, %v4292_v3  ;;  %v421_v27 = vmax.f32 %v405_v24, %v4294_v4  ;;  %v422_v28 = vmax.f32 %v406_v25, %v4296_v5  ;;  %v407_v29 = vld [vmem:[#allocation11 + $0x30] sm:$0xff]  ;;  %v408_v30 = vld [vmem:[#allocation11 + $0x38] sm:$0xff]  ;;  %v409_v31 = vld [vmem:[#allocation11 + $0x40] sm:$0xff] }
  0x70   : > { %433 = vst [vmem:[#allocation11] sm:$0xff] %v417_v20  ;;  %434 = vst [vmem:[#allocation11 + $0x8] sm:$0xff] %v418_v21  ;;  %v423_v32 = vmax.f32 %v407_v29, %v4298_v6  ;;  %v424_v33 = vmax.f32 %v408_v30, %v4300_v7  ;;  %v425_v34 = vmax.f32 %v409_v31, %v4302_v8  ;;  %v410_v35 = vld [vmem:[#allocation11 + $0x48] sm:$0xff]  ;;  %v411_v36 = vld [vmem:[#allocation11 + $0x50] sm:$0xff] }
  0x71   : > { %435 = vst [vmem:[#allocation11 + $0x10] sm:$0xff] %v419_v22  ;;  %v412_v37 = vld [vmem:[#allocation11 + $0x58] sm:$0xff]  ;;  %436 = vst [vmem:[#allocation11 + $0x18] sm:$0xff] %v420_v26  ;;  %v426_v38 = vmax.f32 %v410_v35, %v4304_v9  ;;  %v427_v39 = vmax.f32 %v411_v36, %v4306_v10  ;;  %v413_v41 = vld [vmem:[#allocation11 + $0x60] sm:$0xff] }
  0x72   : > { %437 = vst [vmem:[#allocation11 + $0x20] sm:$0xff] %v421_v27  ;;  %438 = vst [vmem:[#allocation11 + $0x28] sm:$0xff] %v422_v28  ;;  %v428_v40 = vmax.f32 %v412_v37, %v4308_v11  ;;  %v414_v42 = vld [vmem:[#allocation11 + $0x68] sm:$0xff]  ;;  %v415_v43 = vld [vmem:[#allocation11 + $0x70] sm:$0xff]  ;;  %v429_v44 = vmax.f32 %v413_v41, %v4310_v12 }
  0x73   : > { %439 = vst [vmem:[#allocation11 + $0x30] sm:$0xff] %v423_v32  ;;  %440 = vst [vmem:[#allocation11 + $0x38] sm:$0xff] %v424_v33  ;;  %v430_v45 = vmax.f32 %v414_v42, %v4312_v13  ;;  %v431_v46 = vmax.f32 %v415_v43, %v4314_v14  ;;  %v416_v47 = vld [vmem:[#allocation11 + $0x78] sm:$0xff] }
  0x74   : > { %441 = vst [vmem:[#allocation11 + $0x40] sm:$0xff] %v425_v34  ;;  %442 = vst [vmem:[#allocation11 + $0x48] sm:$0xff] %v426_v38  ;;  %v432_v48 = vmax.f32 %v416_v47, %v4316_v15 }
  0x75   : > { %443 = vst [vmem:[#allocation11 + $0x50] sm:$0xff] %v427_v39  ;;  %444 = vst [vmem:[#allocation11 + $0x58] sm:$0xff] %v428_v40 }
  0x76   : > { %445 = vst [vmem:[#allocation11 + $0x60] sm:$0xff] %v429_v44  ;;  %446 = vst [vmem:[#allocation11 + $0x68] sm:$0xff] %v430_v45 }
  0x77   : > { %447 = vst [vmem:[#allocation11 + $0x70] sm:$0xff] %v431_v46  ;;  %448 = vst [vmem:[#allocation11 + $0x78] sm:$0xff] %v432_v48 }
  0x78 PF: > { %s3052_s30 = sshll.u32 %s4090_s27, 9  ;;  %v4355_v49 = vpack.c.bf16 %v4304_v9, %v4288_v1  ;;  %v4359_v50 = vpack.c.bf16 %v4308_v11, %v4292_v3  ;;  %v4401_v35 = vpack.c.bf16 %v4302_v8, %v4286_v0  ;;  %v4405_v36 = vpack.c.bf16 %v4306_v10, %v4290_v2  ;;  %p3042_p5 = scmp.ne.s32.totalorder %s4090_s27, 1 }
  0x79   : > { %s4363_s8 = scalar_lea.vmem [#allocation8], %s3052_s30  ;;  %v4411_v39 = vpack.c.bf16 %v4312_v13, %v4296_v5  ;;  %v4416_v41 = vpack.c.bf16 %v4316_v15, %v4300_v7  ;;  %s4461_s9 = scalar_lea.vmem [#allocation6], %s3052_s30 }
  0x7a   : > { %v3746_v51 = vld [vmem:[%s4363_s8 + $0x78] sm:$0xff]   ;;  %1176 = vmatprep.mubr.bf16.mxu0 %v4355_v49  ;;  %1217 = vmatprep.mubr.bf16.mxu1 %v4359_v50  ;;  %v3750_v55 = vld [vmem:[%s4363_s8 + $0x70] sm:$0xff]   ;;  %v3754_v59 = vld [vmem:[%s4363_s8 + $0x68] sm:$0xff]  }
  0x7b   : > { %v3747_v52 = vld [vmem:[%s4363_s8 + $0xf8] sm:$0xff]   ;;  %3054 = vmatprep.subr.bf16.mxu0 %v3746_v51  ;;  %v3751_v56 = vld [vmem:[%s4363_s8 + $0xf0] sm:$0xff]   ;;  %v3755_v60 = vld [vmem:[%s4363_s8 + $0xe8] sm:$0xff]  }
  0x7c   : > { %v3748_v53 = vld [vmem:[%s4363_s8 + $0x38] sm:$0xff]   ;;  %3076 = vmatprep.subr.bf16.mxu1 %v3747_v52  ;;  %v3752_v57 = vld [vmem:[%s4363_s8 + $0x30] sm:$0xff]   ;;  %v3756_v61 = vld [vmem:[%s4363_s8 + $0x28] sm:$0xff]  }
  0x7d   : > { %v3749_v54 = vld [vmem:[%s4363_s8 + $0xb8] sm:$0xff]   ;;  %3055 = vmatpush3.bf16.msra.mxu0 %v3748_v53  ;;  %v3753_v58 = vld [vmem:[%s4363_s8 + $0xb0] sm:$0xff]   ;;  %v3757_v62 = vld [vmem:[%s4363_s8 + $0xa8] sm:$0xff]  }
  0x7e   : > { %3077 = vmatpush3.bf16.msra.mxu1 %v3749_v54  ;;  %3056 = vmatprep.subr.bf16.mxu0 %v3750_v55  ;;  %v3758_v63 = vld [vmem:[%s4363_s8 + $0x60] sm:$0xff]   ;;  %v3762_v19 = vld [vmem:[%s4363_s8 + $0x58] sm:$0xff]   ;;  %v3766_v23 = vld [vmem:[%s4363_s8 + $0x50] sm:$0xff]  }
  0x7f   : > { %3078 = vmatprep.subr.bf16.mxu1 %v3751_v56  ;;  %v3759_v16 = vld [vmem:[%s4363_s8 + $0xe0] sm:$0xff]   ;;  %v3763_v20 = vld [vmem:[%s4363_s8 + $0xd8] sm:$0xff]   ;;  %v3767_v24 = vld [vmem:[%s4363_s8 + $0xd0] sm:$0xff]  }
  0x80   : > { %v3760_v17 = vld [vmem:[%s4363_s8 + $0x20] sm:$0xff]   ;;  %v3764_v21 = vld [vmem:[%s4363_s8 + $0x18] sm:$0xff]   ;;  %v3768_v25 = vld [vmem:[%s4363_s8 + $0x10] sm:$0xff]  }
  0x81   : > { %3057 = vmatpush3.bf16.msra.mxu0 %v3752_v57  ;;  %v3761_v18 = vld [vmem:[%s4363_s8 + $0xa0] sm:$0xff]   ;;  %v3765_v22 = vld [vmem:[%s4363_s8 + $0x98] sm:$0xff]   ;;  %v3769_v26 = vld [vmem:[%s4363_s8 + $0x90] sm:$0xff]  }
  0x82   : > { %3079 = vmatpush3.bf16.msra.mxu1 %v3753_v58  ;;  %3058 = vmatprep.subr.bf16.mxu0 %v3754_v59  ;;  %v3770_v27 = vld [vmem:[%s4363_s8 + $0x48] sm:$0xff]   ;;  %v3774_v31 = vld [vmem:[%s4363_s8 + $0x40] sm:$0xff]   ;;  %v3778_v37 = vld [vmem:[%s4363_s8 + $0x178] sm:$0xff]  }
  0x83   : > { %3080 = vmatprep.subr.bf16.mxu1 %v3755_v60  ;;  %v3771_v28 = vld [vmem:[%s4363_s8 + $0xc8] sm:$0xff]   ;;  %v3775_v32 = vld [vmem:[%s4363_s8 + $0xc0] sm:$0xff]   ;;  %v3779_v38 = vld [vmem:[%s4363_s8 + $0x1f8] sm:$0xff]  }
  0x84   : > { %v3772_v29 = vld [vmem:[%s4363_s8 + $0x8] sm:$0xff]   ;;  %v3776_v33 = vld [vmem:[%s4363_s8] sm:$0xff]   ;;  %v3780_v40 = vld [vmem:[%s4363_s8 + $0x138] sm:$0xff]  }
  0x85   : > { %3059 = vmatpush3.bf16.msra.mxu0 %v3756_v61  ;;  %v3773_v30 = vld [vmem:[%s4363_s8 + $0x88] sm:$0xff]   ;;  %v3777_v34 = vld [vmem:[%s4363_s8 + $0x80] sm:$0xff]   ;;  %v3781_v42 = vld [vmem:[%s4363_s8 + $0x1b8] sm:$0xff]  }
  0x86   : > { %3081 = vmatpush3.bf16.msra.mxu1 %v3757_v62  ;;  %3060 = vmatprep.subr.bf16.mxu0 %v3758_v63  ;;  %v3782_v43 = vld [vmem:[%s4363_s8 + $0x170] sm:$0xff]   ;;  %v3786_v47 = vld [vmem:[%s4363_s8 + $0x168] sm:$0xff]   ;;  %v3790_v53 = vld [vmem:[%s4363_s8 + $0x160] sm:$0xff]  }
  0x87   : > { %3082 = vmatprep.subr.bf16.mxu1 %v3759_v16  ;;  %v3783_v44 = vld [vmem:[%s4363_s8 + $0x1f0] sm:$0xff]   ;;  %v3787_v48 = vld [vmem:[%s4363_s8 + $0x1e8] sm:$0xff]   ;;  %v3791_v54 = vld [vmem:[%s4363_s8 + $0x1e0] sm:$0xff]  }
  0x88   : > { %v3784_v45 = vld [vmem:[%s4363_s8 + $0x130] sm:$0xff]   ;;  %v3788_v51 = vld [vmem:[%s4363_s8 + $0x128] sm:$0xff]   ;;  %v3792_v55 = vld [vmem:[%s4363_s8 + $0x120] sm:$0xff]  }
  0x89   : > { %3061 = vmatpush3.bf16.msra.mxu0 %v3760_v17  ;;  %v3785_v46 = vld [vmem:[%s4363_s8 + $0x1b0] sm:$0xff]   ;;  %v3789_v52 = vld [vmem:[%s4363_s8 + $0x1a8] sm:$0xff]   ;;  %v3793_v56 = vld [vmem:[%s4363_s8 + $0x1a0] sm:$0xff]  }
  0x8a   : > { %3083 = vmatpush3.bf16.msra.mxu1 %v3761_v18  ;;  %3062 = vmatprep.subr.bf16.mxu0 %v3762_v19  ;;  %v3794_v57 = vld [vmem:[%s4363_s8 + $0x158] sm:$0xff]   ;;  %v3798_v61 = vld [vmem:[%s4363_s8 + $0x150] sm:$0xff]   ;;  %v3802_v17 = vld [vmem:[%s4363_s8 + $0x148] sm:$0xff]  }
  0x8b   : > { %3084 = vmatprep.subr.bf16.mxu1 %v3763_v20  ;;  %v3795_v58 = vld [vmem:[%s4363_s8 + $0x1d8] sm:$0xff]   ;;  %v3799_v62 = vld [vmem:[%s4363_s8 + $0x1d0] sm:$0xff]   ;;  %v3803_v18 = vld [vmem:[%s4363_s8 + $0x1c8] sm:$0xff]  }
  0x8c   : > { %v3796_v59 = vld [vmem:[%s4363_s8 + $0x118] sm:$0xff]   ;;  %v3800_v63 = vld [vmem:[%s4363_s8 + $0x110] sm:$0xff]   ;;  %v3804_v19 = vld [vmem:[%s4363_s8 + $0x108] sm:$0xff]  }
  0x8d   : > { %3063 = vmatpush3.bf16.msra.mxu0 %v3764_v21  ;;  %v3797_v60 = vld [vmem:[%s4363_s8 + $0x198] sm:$0xff]   ;;  %v3801_v16 = vld [vmem:[%s4363_s8 + $0x190] sm:$0xff]   ;;  %v3805_v20 = vld [vmem:[%s4363_s8 + $0x188] sm:$0xff]  }
  0x8e   : > { %3085 = vmatpush3.bf16.msra.mxu1 %v3765_v22  ;;  %3064 = vmatprep.subr.bf16.mxu0 %v3766_v23  ;;  %v3806_v21 = vld [vmem:[%s4363_s8 + $0x140] sm:$0xff]  }
  0x8f   : > { %3086 = vmatprep.subr.bf16.mxu1 %v3767_v24  ;;  %v3807_v22 = vld [vmem:[%s4363_s8 + $0x1c0] sm:$0xff]  }
  0x90   : > { %v3808_v23 = vld [vmem:[%s4363_s8 + $0x100] sm:$0xff]  }
  0x91   : > { %3065 = vmatpush3.bf16.msra.mxu0 %v3768_v25  ;;  %v3809_v24 = vld [vmem:[%s4363_s8 + $0x180] sm:$0xff]   ;;  %v4453_v25 = vpack.c.bf16 %v4310_v12, %v4294_v4  ;;  %v4639_v12 = vld [vmem:[%s4461_s9 + $0x128] sm:$0xff]  }
  0x92   : > { %3087 = vmatpush3.bf16.msra.mxu1 %v3769_v26  ;;  %3066 = vmatprep.subr.bf16.mxu0 %v3770_v27  ;;  %v4457_v26 = vpack.c.bf16 %v4314_v14, %v4298_v6  ;;  %v4464_v27 = vld [vmem:[%s4461_s9 + $0x78] sm:$0xff]   ;;  %v4631_v14 = vld [vmem:[%s4461_s9 + $0x168] sm:$0xff]   ;;  %5288 = vst [vmem:[#allocation32_spill] sm:$0xff] %v4639_v12 }
  0x93   : > { %3088 = vmatprep.subr.bf16.mxu1 %v3771_v28  ;;  %v4467_v28 = vld [vmem:[%s4461_s9 + $0xf8] sm:$0xff]   ;;  %5286 = vst [vmem:[#allocation30_spill] sm:$0xff] %v4631_v14  ;;  %v4635_v6 = vld [vmem:[%s4461_s9 + $0x1e8] sm:$0xff]  }
  0x94   : > { %5287 = vst [vmem:[#allocation31_spill] sm:$0xff] %v4635_v6  ;;  %v4643_v4 = vld [vmem:[%s4461_s9 + $0x1a8] sm:$0xff]  }
  0x95   : > { %3067 = vmatpush3.bf16.msra.mxu0 %v3772_v29  ;;  %v4471_v29 = vld [vmem:[%s4461_s9 + $0x38] sm:$0xff]   ;;  %5289 = vst [vmem:[#allocation33_spill] sm:$0xff] %v4643_v4 }
  0x96   : > { %3089 = vmatpush3.bf16.msra.mxu1 %v3773_v30  ;;  %3068 = vmatprep.subr.bf16.mxu0 %v3774_v31  ;;  %v4476_v30 = vld [vmem:[%s4461_s9 + $0xb8] sm:$0xff]   ;;  %v4481_v31 = vld [vmem:[%s4461_s9 + $0x70] sm:$0xff]  }
  0x97   : > { %3090 = vmatprep.subr.bf16.mxu1 %v3775_v32  ;;  %v4485_v32 = vld [vmem:[%s4461_s9 + $0xf0] sm:$0xff]  }
  0x99   : > { %3069 = vmatpush3.bf16.msra.mxu0 %v3776_v33  ;;  %v4490_v33 = vld [vmem:[%s4461_s9 + $0x30] sm:$0xff]  }
  0x9a   : > { %3091 = vmatpush3.bf16.msra.mxu1 %v3777_v34  ;;  %3098 = vmatprep.subr.bf16.mxu0 %v3778_v37  ;;  %v4495_v34 = vld [vmem:[%s4461_s9 + $0xb0] sm:$0xff]   ;;  %v4499_v37 = vld [vmem:[%s4461_s9 + $0x68] sm:$0xff]  }
  0x9b   : > { %3120 = vmatprep.subr.bf16.mxu1 %v3779_v38  ;;  %v4503_v38 = vld [vmem:[%s4461_s9 + $0xe8] sm:$0xff]  }
  0x9c   : > { %1177 = vmatmul.mubr.bf16.vlgmr.msra.gmra.mxu0 %v4401_v35 }
  0x9d   : > { %1218 = vmatmul.mubr.bf16.vlgmr.msra.gmra.mxu1 %v4405_v36  ;;  %3099 = vmatpush3.bf16.msra.mxu0 %v3780_v40  ;;  %v4507_v40 = vld [vmem:[%s4461_s9 + $0x28] sm:$0xff]  }
  0x9e   : > { %3121 = vmatpush3.bf16.msra.mxu1 %v3781_v42  ;;  %1258 = vmatprep.mubr.bf16.mxu0 %v4411_v39  ;;  %v4511_v42 = vld [vmem:[%s4461_s9 + $0xa8] sm:$0xff]  }
  0x9f   : > { %3100 = vmatprep.subr.bf16.mxu0 %v3782_v43  ;;  %1299 = vmatprep.mubr.bf16.mxu1 %v4416_v41  ;;  %v4515_v43 = vld [vmem:[%s4461_s9 + $0x60] sm:$0xff]  }
  0xa0   : > { %3122 = vmatprep.subr.bf16.mxu1 %v3783_v44  ;;  %v4519_v44 = vld [vmem:[%s4461_s9 + $0xe0] sm:$0xff]  }
  0xa1   : > { %3101 = vmatpush3.bf16.msra.mxu0 %v3784_v45  ;;  %v4523_v45 = vld [vmem:[%s4461_s9 + $0x20] sm:$0xff]  }
  0xa2   : > { %3123 = vmatpush3.bf16.msra.mxu1 %v3785_v46  ;;  %3102 = vmatprep.subr.bf16.mxu0 %v3786_v47  ;;  %v4527_v46 = vld [vmem:[%s4461_s9 + $0xa0] sm:$0xff]   ;;  %v4531_v47 = vld [vmem:[%s4461_s9 + $0x58] sm:$0xff]  }
  0xa3   : > { %3124 = vmatprep.subr.bf16.mxu1 %v3787_v48  ;;  %v4535_v48 = vld [vmem:[%s4461_s9 + $0xd8] sm:$0xff]  }
  0xa5   : > { %3103 = vmatpush3.bf16.msra.mxu0 %v3788_v51  ;;  %v4539_v51 = vld [vmem:[%s4461_s9 + $0x18] sm:$0xff]  }
  0xa6   : > { %3125 = vmatpush3.bf16.msra.mxu1 %v3789_v52  ;;  %3104 = vmatprep.subr.bf16.mxu0 %v3790_v53  ;;  %v4543_v52 = vld [vmem:[%s4461_s9 + $0x98] sm:$0xff]   ;;  %v4547_v53 = vld [vmem:[%s4461_s9 + $0x50] sm:$0xff]  }
  0xa7   : > { %3126 = vmatprep.subr.bf16.mxu1 %v3791_v54  ;;  %v4551_v54 = vld [vmem:[%s4461_s9 + $0xd0] sm:$0xff]  }
  0xa9   : > { %3105 = vmatpush3.bf16.msra.mxu0 %v3792_v55  ;;  %v4555_v55 = vld [vmem:[%s4461_s9 + $0x10] sm:$0xff]  }
  0xaa   : > { %3127 = vmatpush3.bf16.msra.mxu1 %v3793_v56  ;;  %3106 = vmatprep.subr.bf16.mxu0 %v3794_v57  ;;  %v4559_v56 = vld [vmem:[%s4461_s9 + $0x90] sm:$0xff]   ;;  %v4563_v57 = vld [vmem:[%s4461_s9 + $0x48] sm:$0xff]  }
  0xab   : > { %3128 = vmatprep.subr.bf16.mxu1 %v3795_v58  ;;  %v4567_v58 = vld [vmem:[%s4461_s9 + $0xc8] sm:$0xff]  }
  0xad   : > { %3107 = vmatpush3.bf16.msra.mxu0 %v3796_v59  ;;  %v4571_v59 = vld [vmem:[%s4461_s9 + $0x8] sm:$0xff]  }
  0xae   : > { %3129 = vmatpush3.bf16.msra.mxu1 %v3797_v60  ;;  %3108 = vmatprep.subr.bf16.mxu0 %v3798_v61  ;;  %v4575_v60 = vld [vmem:[%s4461_s9 + $0x88] sm:$0xff]   ;;  %v4579_v61 = vld [vmem:[%s4461_s9 + $0x40] sm:$0xff]  }
  0xaf   : > { %3130 = vmatprep.subr.bf16.mxu1 %v3799_v62  ;;  %v4583_v62 = vld [vmem:[%s4461_s9 + $0xc0] sm:$0xff]  }
  0xb1   : > { %3109 = vmatpush3.bf16.msra.mxu0 %v3800_v63  ;;  %v4587_v63 = vld [vmem:[%s4461_s9] sm:$0xff]  }
  0xb2   : > { %3131 = vmatpush3.bf16.msra.mxu1 %v3801_v16  ;;  %3110 = vmatprep.subr.bf16.mxu0 %v3802_v17  ;;  %v4591_v16 = vld [vmem:[%s4461_s9 + $0x80] sm:$0xff]   ;;  %v4595_v17 = vld [vmem:[%s4461_s9 + $0x178] sm:$0xff]  }
  0xb3   : > { %3132 = vmatprep.subr.bf16.mxu1 %v3803_v18  ;;  %v4599_v18 = vld [vmem:[%s4461_s9 + $0x1f8] sm:$0xff]  }
  0xb4   : > { %5279 = vst [vmem:[#allocation23_spill] sm:$0xff] %v4599_v18 }
  0xb5   : > { %3111 = vmatpush3.bf16.msra.mxu0 %v3804_v19  ;;  %v4603_v19 = vld [vmem:[%s4461_s9 + $0x138] sm:$0xff]  }
  0xb6   : > { %3133 = vmatpush3.bf16.msra.mxu1 %v3805_v20  ;;  %3112 = vmatprep.subr.bf16.mxu0 %v3806_v21  ;;  %5280 = vst [vmem:[#allocation24_spill] sm:$0xff] %v4603_v19  ;;  %v4608_v20 = vld [vmem:[%s4461_s9 + $0x1b8] sm:$0xff]   ;;  %v4613_v21 = vld [vmem:[%s4461_s9 + $0x170] sm:$0xff]  }
  0xb7   : > { %3134 = vmatprep.subr.bf16.mxu1 %v3807_v22  ;;  %5281 = vst [vmem:[#allocation25_spill] sm:$0xff] %v4608_v20  ;;  %5282 = vst [vmem:[#allocation26_spill] sm:$0xff] %v4613_v21  ;;  %v4617_v22 = vld [vmem:[%s4461_s9 + $0x1f0] sm:$0xff]  }
  0xb8   : > { %5283 = vst [vmem:[#allocation27_spill] sm:$0xff] %v4617_v22 }
  0xb9   : > { %3113 = vmatpush3.bf16.msra.mxu0 %v3808_v23  ;;  %v4622_v23 = vld [vmem:[%s4461_s9 + $0x130] sm:$0xff]  }
  0xba   : > { %3135 = vmatpush3.bf16.msra.mxu1 %v3809_v24  ;;  %3142 = vmatprep.subr.bf16.mxu0 %v4464_v27  ;;  %5284 = vst [vmem:[#allocation28_spill] sm:$0xff] %v4622_v23  ;;  %v4627_v24 = vld [vmem:[%s4461_s9 + $0x1b0] sm:$0xff]  }
  0xbb   : > { %3164 = vmatprep.subr.bf16.mxu1 %v4467_v28  ;;  %5285 = vst [vmem:[#allocation29_spill] sm:$0xff] %v4627_v24 }
  0xbc   : > { %1259 = vmatmul.mubr.bf16.vlgmr.msra.gmra.mxu0 %v4453_v25 }
  0xbd   : > { %1300 = vmatmul.mubr.bf16.vlgmr.msra.gmra.mxu1 %v4457_v26  ;;  %3143 = vmatpush3.bf16.msra.mxu0 %v4471_v29 }
  0xbe   : > { %3165 = vmatpush3.bf16.msra.mxu1 %v4476_v30  ;;  %1724 = vmatprep.mubr.bf16.mxu0 %v4355_v49 }
  0xbf   : > { %3144 = vmatprep.subr.bf16.mxu0 %v4481_v31  ;;  %1765 = vmatprep.mubr.bf16.mxu1 %v4359_v50 }
  0xc0   : > { %3166 = vmatprep.subr.bf16.mxu1 %v4485_v32 }
  0xc1   : > { %3145 = vmatpush3.bf16.msra.mxu0 %v4490_v33 }
  0xc2   : > { %3167 = vmatpush3.bf16.msra.mxu1 %v4495_v34  ;;  %3146 = vmatprep.subr.bf16.mxu0 %v4499_v37 }
  0xc3   : > { %3168 = vmatprep.subr.bf16.mxu1 %v4503_v38 }
  0xc5   : > { %3147 = vmatpush3.bf16.msra.mxu0 %v4507_v40 }
  0xc6   : > { %3169 = vmatpush3.bf16.msra.mxu1 %v4511_v42  ;;  %3148 = vmatprep.subr.bf16.mxu0 %v4515_v43 }
  0xc7   : > { %3170 = vmatprep.subr.bf16.mxu1 %v4519_v44 }
  0xc9   : > { %3149 = vmatpush3.bf16.msra.mxu0 %v4523_v45 }
  0xca   : > { %3171 = vmatpush3.bf16.msra.mxu1 %v4527_v46  ;;  %3150 = vmatprep.subr.bf16.mxu0 %v4531_v47 }
  0xcb   : > { %3172 = vmatprep.subr.bf16.mxu1 %v4535_v48 }
  0xcd   : > { %3151 = vmatpush3.bf16.msra.mxu0 %v4539_v51 }
  0xce   : > { %3173 = vmatpush3.bf16.msra.mxu1 %v4543_v52  ;;  %3152 = vmatprep.subr.bf16.mxu0 %v4547_v53 }
  0xcf   : > { %3174 = vmatprep.subr.bf16.mxu1 %v4551_v54 }
  0xd1   : > { %3153 = vmatpush3.bf16.msra.mxu0 %v4555_v55 }
  0xd2   : > { %3175 = vmatpush3.bf16.msra.mxu1 %v4559_v56  ;;  %3154 = vmatprep.subr.bf16.mxu0 %v4563_v57 }
  0xd3   : > { %3176 = vmatprep.subr.bf16.mxu1 %v4567_v58 }
  0xd5   : > { %3155 = vmatpush3.bf16.msra.mxu0 %v4571_v59 }
  0xd6   : > { %3177 = vmatpush3.bf16.msra.mxu1 %v4575_v60  ;;  %3156 = vmatprep.subr.bf16.mxu0 %v4579_v61 }
  0xd7   : > { %3178 = vmatprep.subr.bf16.mxu1 %v4583_v62 }
  0xd9   : > { %3157 = vmatpush3.bf16.msra.mxu0 %v4587_v63 }
  0xda   : > { %3179 = vmatpush3.bf16.msra.mxu1 %v4591_v16  ;;  %3186 = vmatprep.subr.bf16.mxu0 %v4595_v17 }
  0xdb   : > { %3208 = vmatprep.subr.bf16.mxu1 %v4599_v18  ;;  %v4729_v18 = vld [vmem:[%s4461_s9 + $0x180] sm:$0xff]  }
  0xdc   : > { %1725 = vmatmul.mubr.bf16.vlgmr.msra.gmra.mxu0 %v4401_v35 }
  0xdd   : > { %1766 = vmatmul.mubr.bf16.vlgmr.msra.gmra.mxu1 %v4405_v36  ;;  %3187 = vmatpush3.bf16.msra.mxu0 %v4603_v19  ;;  %v4723_v19 = vld [vmem:[%s4461_s9 + $0x100] sm:$0xff]  }
  0xde   : > { %3209 = vmatpush3.bf16.msra.mxu1 %v4608_v20  ;;  %1806 = vmatprep.mubr.bf16.mxu0 %v4411_v39  ;;  %v468_v20 = vunpack.c.h.bf16 %v4359_v50 }
  0xdf   : > { %3188 = vmatprep.subr.bf16.mxu0 %v4613_v21  ;;  %1847 = vmatprep.mubr.bf16.mxu1 %v4416_v41  ;;  %v4709_v21 = vld [vmem:[%s4461_s9 + $0x188] sm:$0xff]  }
  0xe0   : > { %3210 = vmatprep.subr.bf16.mxu1 %v4617_v22  ;;  %v4687_v22 = vld [vmem:[%s4461_s9 + $0x110] sm:$0xff]  }
  0xe1   : > { %3189 = vmatpush3.bf16.msra.mxu0 %v4622_v23  ;;  %v4647_v23 = vld [vmem:[%s4461_s9 + $0x160] sm:$0xff]   ;;  %5300 = vst [vmem:[#allocation44_spill] sm:$0xff] %v4687_v22 }
  0xe2   : > { %3211 = vmatpush3.bf16.msra.mxu1 %v4627_v24  ;;  %3190 = vmatprep.subr.bf16.mxu0 %v4631_v14  ;;  %5290 = vst [vmem:[#allocation34_spill] sm:$0xff] %v4647_v23  ;;  %v4651_v24 = vld [vmem:[%s4461_s9 + $0x1e0] sm:$0xff]  }
  0xe3   : > { %3212 = vmatprep.subr.bf16.mxu1 %v4635_v6  ;;  %5291 = vst [vmem:[#allocation35_spill] sm:$0xff] %v4651_v24  ;;  %v4655_v14 = vld [vmem:[%s4461_s9 + $0x120] sm:$0xff]  }
  0xe4   : > { %5292 = vst [vmem:[#allocation36_spill] sm:$0xff] %v4655_v14  ;;  %v4659_v6 = vld [vmem:[%s4461_s9 + $0x1a0] sm:$0xff]  }
  0xe5   : > { %3191 = vmatpush3.bf16.msra.mxu0 %v4639_v12  ;;  %5293 = vst [vmem:[#allocation37_spill] sm:$0xff] %v4659_v6  ;;  %v4663_v12 = vld [vmem:[%s4461_s9 + $0x158] sm:$0xff]  }
  0xe6   : > { %3213 = vmatpush3.bf16.msra.mxu1 %v4643_v4  ;;  %3192 = vmatprep.subr.bf16.mxu0 %v4647_v23  ;;  %5294 = vst [vmem:[#allocation38_spill] sm:$0xff] %v4663_v12  ;;  %v4667_v4 = vld [vmem:[%s4461_s9 + $0x1d8] sm:$0xff]  }
  0xe7   : > { %3214 = vmatprep.subr.bf16.mxu1 %v4651_v24  ;;  %5295 = vst [vmem:[#allocation39_spill] sm:$0xff] %v4667_v4  ;;  %v4671_v23 = vld [vmem:[%s4461_s9 + $0x118] sm:$0xff]  }
  0xe8   : > { %5296 = vst [vmem:[#allocation40_spill] sm:$0xff] %v4671_v23  ;;  %v4675_v24 = vld [vmem:[%s4461_s9 + $0x198] sm:$0xff]  }
  0xe9   : > { %3193 = vmatpush3.bf16.msra.mxu0 %v4655_v14  ;;  %5297 = vst [vmem:[#allocation41_spill] sm:$0xff] %v4675_v24  ;;  %v4679_v14 = vld [vmem:[%s4461_s9 + $0x150] sm:$0xff]  }
  0xea   : > { %3215 = vmatpush3.bf16.msra.mxu1 %v4659_v6  ;;  %3194 = vmatprep.subr.bf16.mxu0 %v4663_v12  ;;  %5298 = vst [vmem:[#allocation42_spill] sm:$0xff] %v4679_v14  ;;  %v4683_v6 = vld [vmem:[%s4461_s9 + $0x1d0] sm:$0xff]  }
  0xeb   : > { %3216 = vmatprep.subr.bf16.mxu1 %v4667_v4  ;;  %5299 = vst [vmem:[#allocation43_spill] sm:$0xff] %v4683_v6  ;;  %v4691_v12 = vld [vmem:[%s4461_s9 + $0x190] sm:$0xff]   ;;  %v458_v4 = vunpack.c.l.bf16 %v4355_v49 }
  0xec   : > { %5301 = vst [vmem:[#allocation45_spill] sm:$0xff] %v4691_v12 }
  0xed   : > { %3195 = vmatpush3.bf16.msra.mxu0 %v4671_v23  ;;  %v4695_v23 = vld [vmem:[%s4461_s9 + $0x148] sm:$0xff]  }
  0xee   : > { %3217 = vmatpush3.bf16.msra.mxu1 %v4675_v24  ;;  %3196 = vmatprep.subr.bf16.mxu0 %v4679_v14  ;;  %5302 = vst [vmem:[#allocation46_spill] sm:$0xff] %v4695_v23  ;;  %v4699_v24 = vld [vmem:[%s4461_s9 + $0x1c8] sm:$0xff]  }
  0xef   : > { %3218 = vmatprep.subr.bf16.mxu1 %v4683_v6  ;;  %5303 = vst [vmem:[#allocation47_spill] sm:$0xff] %v4699_v24  ;;  %v4703_v14 = vld [vmem:[%s4461_s9 + $0x108] sm:$0xff]   ;;  %v466_v6 = vunpack.c.h.bf16 %v4355_v49  ;;  %v474_v49 = vsub.f32 %v4288_v1, %v458_v4  ;;  %v465_v4 = vunpack.c.h.bf16 %v4401_v35 }
  0xf0   : > { %5304 = vst [vmem:[#allocation48_spill] sm:$0xff] %v4703_v14 }
  0xf1   : > { %3197 = vmatpush3.bf16.msra.mxu0 %v4687_v22  ;;  %v460_v22 = vunpack.c.l.bf16 %v4359_v50 }
  0xf2   : > { %3219 = vmatpush3.bf16.msra.mxu1 %v4691_v12  ;;  %3198 = vmatprep.subr.bf16.mxu0 %v4695_v23  ;;  %v4715_v12 = vld [vmem:[%s4461_s9 + $0x140] sm:$0xff]  }
  0xf3   : > { %3220 = vmatprep.subr.bf16.mxu1 %v4699_v24  ;;  %5305 = vst [vmem:[#allocation49_spill] sm:$0xff] %v4715_v12  ;;  %v4719_v23 = vld [vmem:[%s4461_s9 + $0x1c0] sm:$0xff]   ;;  %v482_v24 = vsub.f32 %v4304_v9, %v466_v6  ;;  %v476_v50 = vsub.f32 %v4292_v3, %v460_v22  ;;  %v457_v3 = vunpack.c.l.bf16 %v4401_v35  ;;  %v459_v6 = vunpack.c.l.bf16 %v4405_v36 }
  0xf4   : > { %v467_v9 = vunpack.c.h.bf16 %v4405_v36  ;;  %v481_v35 = vsub.f32 %v4302_v8, %v465_v4 }
  0xf5   : > { %3199 = vmatpush3.bf16.msra.mxu0 %v4703_v14  ;;  %v484_v14 = vsub.f32 %v4308_v11, %v468_v20  ;;  %v462_v11 = vunpack.c.l.bf16 %v4411_v39  ;;  %v475_v36 = vsub.f32 %v4290_v2, %v459_v6 }
  0xf6   : > { %3221 = vmatpush3.bf16.msra.mxu1 %v4709_v21  ;;  %3200 = vmatprep.subr.bf16.mxu0 %v4715_v12  ;;  %v490_v12 = vpack.c.bf16 %v482_v24, %v474_v49  ;;  %v5334_v24 = vld [vmem:[#allocation20_spill] sm:$0xff]  ;;  %v5335_v49 = vld [vmem:[#allocation22_spill] sm:$0xff] }
  0xf7   : > { %3222 = vmatprep.subr.bf16.mxu1 %v4719_v23  ;;  %v492_v1 = vpack.c.bf16 %v484_v14, %v476_v50  ;;  %v473_v14 = vsub.f32 %v4286_v0, %v457_v3  ;;  %v478_v0 = vsub.f32 %v4296_v5, %v462_v11  ;;  %v5307_v5 = vld [vmem:[#allocation24_spill] sm:$0xff] }
  0xf8   : > { %v5333_v22 = vld [vmem:[#allocation48_spill] sm:$0xff] }
  0xf9   : > { %3201 = vmatpush3.bf16.msra.mxu0 %v4723_v19 }
  0xfa   : > { %3223 = vmatpush3.bf16.msra.mxu1 %v4729_v18  ;;  %3230 = vmatprep.subr.bf16.mxu0 %v4464_v27  ;;  %v464_v27 = vunpack.c.l.bf16 %v4416_v41 }
  0xfb   : > { %3252 = vmatprep.subr.bf16.mxu1 %v4467_v28  ;;  %v472_v28 = vunpack.c.h.bf16 %v4416_v41 }
  0xfc   : > { %1807 = vmatmul.mubr.bf16.vlgmr.msra.gmra.mxu0 %v4453_v25 }
  0xfd   : > { %1848 = vmatmul.mubr.bf16.vlgmr.msra.gmra.mxu1 %v4457_v26  ;;  %3231 = vmatpush3.bf16.msra.mxu0 %v4471_v29  ;;  %v483_v29 = vsub.f32 %v4306_v10, %v467_v9  ;;  %v488_v41 = vsub.f32 %v4316_v15, %v472_v28  ;;  %v5306_v10 = vld [vmem:[#allocation23_spill] sm:$0xff] }
  0xfe   : > { %3253 = vmatpush3.bf16.msra.mxu1 %v4476_v30  ;;  %3232 = vmatprep.subr.bf16.mxu0 %v4481_v31  ;;  %v480_v30 = vsub.f32 %v4300_v7, %v464_v27  ;;  %v5309_v7 = vld [vmem:[#allocation26_spill] sm:$0xff]  ;;  %v5310_v15 = vld [vmem:[#allocation27_spill] sm:$0xff] }
  0xff   : > { %3254 = vmatprep.subr.bf16.mxu1 %v4485_v32  ;;  %1888 = vmatprep.mubr.bf16.mxu0 %v490_v12  ;;  %v470_v12 = vunpack.c.h.bf16 %v4411_v39  ;;  %v489_v39 = vpack.c.bf16 %v481_v35, %v473_v14  ;;  %v491_v2 = vpack.c.bf16 %v483_v29, %v475_v36 }
 0x100   : > { %1929 = vmatprep.mubr.bf16.mxu1 %v492_v1  ;;  %v496_v32 = vpack.c.bf16 %v488_v41, %v480_v30  ;;  %v5336_v1 = vld [vmem:[#allocation49_spill] sm:$0xff] }
 0x101   : > { %3233 = vmatpush3.bf16.msra.mxu0 %v4490_v33  ;;  %v486_v8 = vsub.f32 %v4312_v13, %v470_v12  ;;  %v5308_v13 = vld [vmem:[#allocation25_spill] sm:$0xff]  ;;  %v5311_v33 = vld [vmem:[#allocation28_spill] sm:$0xff] }
 0x102   : > { %3255 = vmatpush3.bf16.msra.mxu1 %v4495_v34  ;;  %3234 = vmatprep.subr.bf16.mxu0 %v4499_v37  ;;  %v5312_v34 = vld [vmem:[#allocation29_spill] sm:$0xff]  ;;  %v5313_v37 = vld [vmem:[#allocation30_spill] sm:$0xff] }
 0x103   : > { %3256 = vmatprep.subr.bf16.mxu1 %v4503_v38  ;;  %v494_v31 = vpack.c.bf16 %v486_v8, %v478_v0  ;;  %v5314_v38 = vld [vmem:[#allocation31_spill] sm:$0xff] }
 0x105   : > { %3235 = vmatpush3.bf16.msra.mxu0 %v4507_v40  ;;  %v5315_v40 = vld [vmem:[#allocation32_spill] sm:$0xff] }
 0x106   : > { %3257 = vmatpush3.bf16.msra.mxu1 %v4511_v42  ;;  %3236 = vmatprep.subr.bf16.mxu0 %v4515_v43  ;;  %v5316_v42 = vld [vmem:[#allocation33_spill] sm:$0xff]  ;;  %v5317_v43 = vld [vmem:[#allocation34_spill] sm:$0xff] }
 0x107   : > { %3258 = vmatprep.subr.bf16.mxu1 %v4519_v44  ;;  %v5318_v44 = vld [vmem:[#allocation35_spill] sm:$0xff] }
 0x109   : > { %3237 = vmatpush3.bf16.msra.mxu0 %v4523_v45  ;;  %v5319_v45 = vld [vmem:[#allocation36_spill] sm:$0xff] }
 0x10a   : > { %3259 = vmatpush3.bf16.msra.mxu1 %v4527_v46  ;;  %3238 = vmatprep.subr.bf16.mxu0 %v4531_v47  ;;  %v5320_v46 = vld [vmem:[#allocation37_spill] sm:$0xff]  ;;  %v5321_v47 = vld [vmem:[#allocation38_spill] sm:$0xff] }
 0x10b   : > { %3260 = vmatprep.subr.bf16.mxu1 %v4535_v48  ;;  %v5322_v48 = vld [vmem:[#allocation39_spill] sm:$0xff] }
 0x10d   : > { %3239 = vmatpush3.bf16.msra.mxu0 %v4539_v51  ;;  %v5323_v51 = vld [vmem:[#allocation40_spill] sm:$0xff] }
 0x10e   : > { %3261 = vmatpush3.bf16.msra.mxu1 %v4543_v52  ;;  %3240 = vmatprep.subr.bf16.mxu0 %v4547_v53  ;;  %v5324_v52 = vld [vmem:[#allocation41_spill] sm:$0xff]  ;;  %v5325_v53 = vld [vmem:[#allocation42_spill] sm:$0xff] }
 0x10f   : > { %3262 = vmatprep.subr.bf16.mxu1 %v4551_v54  ;;  %v5326_v54 = vld [vmem:[#allocation43_spill] sm:$0xff] }
 0x111   : > { %3241 = vmatpush3.bf16.msra.mxu0 %v4555_v55  ;;  %v461_v55 = vunpack.c.l.bf16 %v4453_v25 }
 0x112   : > { %3263 = vmatpush3.bf16.msra.mxu1 %v4559_v56  ;;  %3242 = vmatprep.subr.bf16.mxu0 %v4563_v57  ;;  %v469_v56 = vunpack.c.h.bf16 %v4453_v25  ;;  %v5327_v57 = vld [vmem:[#allocation44_spill] sm:$0xff] }
 0x113   : > { %3264 = vmatprep.subr.bf16.mxu1 %v4567_v58  ;;  %v463_v58 = vunpack.c.l.bf16 %v4457_v26 }
 0x115   : > { %3243 = vmatpush3.bf16.msra.mxu0 %v4571_v59  ;;  %v471_v59 = vunpack.c.h.bf16 %v4457_v26  ;;  %v479_v25 = vsub.f32 %v5334_v24, %v463_v58 }
 0x116   : > { %3265 = vmatpush3.bf16.msra.mxu1 %v4575_v60  ;;  %3244 = vmatprep.subr.bf16.mxu0 %v4579_v61  ;;  %v5328_v60 = vld [vmem:[#allocation45_spill] sm:$0xff]  ;;  %v5329_v61 = vld [vmem:[#allocation46_spill] sm:$0xff] }
 0x117   : > { %3266 = vmatprep.subr.bf16.mxu1 %v4583_v62  ;;  %v5330_v62 = vld [vmem:[#allocation47_spill] sm:$0xff]  ;;  %v487_v50 = vsub.f32 %v5335_v49, %v471_v59 }
 0x119   : > { %3245 = vmatpush3.bf16.msra.mxu0 %v4587_v63  ;;  %v5331_v63 = vld [vmem:[#allocation19_spill] sm:$0xff]  ;;  %v495_v3 = vpack.c.bf16 %v487_v50, %v479_v25 }
 0x11a   : > { %3267 = vmatpush3.bf16.msra.mxu1 %v4591_v16  ;;  %3274 = vmatprep.subr.bf16.mxu0 %v4595_v17  ;;  %v477_v16 = vsub.f32 %v5331_v63, %v461_v55  ;;  %v5332_v17 = vld [vmem:[#allocation21_spill] sm:$0xff] }
 0x11b   : > { %3296 = vmatprep.subr.bf16.mxu1 %v5306_v10  ;;  %v485_v20 = vsub.f32 %v5332_v17, %v469_v56 }
 0x11c   : > { %1889 = vmatmul.mubr.bf16.vlgmr.msra.gmra.mxu0 %v489_v39 }
 0x11d   : > { %1930 = vmatmul.mubr.bf16.vlgmr.msra.gmra.mxu1 %v491_v2  ;;  %3275 = vmatpush3.bf16.msra.mxu0 %v5307_v5  ;;  %v493_v26 = vpack.c.bf16 %v485_v20, %v477_v16 }
 0x11e   : > { %3297 = vmatpush3.bf16.msra.mxu1 %v5308_v13  ;;  %3276 = vmatprep.subr.bf16.mxu0 %v5309_v7 }
 0x11f   : > { %3298 = vmatprep.subr.bf16.mxu1 %v5310_v15  ;;  %1970 = vmatprep.mubr.bf16.mxu0 %v494_v31 }
 0x120   : > { %2011 = vmatprep.mubr.bf16.mxu1 %v496_v32 }
 0x121   : > { %3277 = vmatpush3.bf16.msra.mxu0 %v5311_v33 }
 0x122   : > { %3299 = vmatpush3.bf16.msra.mxu1 %v5312_v34  ;;  %3278 = vmatprep.subr.bf16.mxu0 %v5313_v37 }
 0x123   : > { %3300 = vmatprep.subr.bf16.mxu1 %v5314_v38 }
 0x125   : > { %3279 = vmatpush3.bf16.msra.mxu0 %v5315_v40 }
 0x126   : > { %3301 = vmatpush3.bf16.msra.mxu1 %v5316_v42  ;;  %3280 = vmatprep.subr.bf16.mxu0 %v5317_v43 }
 0x127   : > { %3302 = vmatprep.subr.bf16.mxu1 %v5318_v44 }
 0x129   : > { %3281 = vmatpush3.bf16.msra.mxu0 %v5319_v45 }
 0x12a   : > { %3303 = vmatpush3.bf16.msra.mxu1 %v5320_v46  ;;  %3282 = vmatprep.subr.bf16.mxu0 %v5321_v47 }
 0x12b   : > { %3304 = vmatprep.subr.bf16.mxu1 %v5322_v48 }
 0x12d   : > { %3283 = vmatpush3.bf16.msra.mxu0 %v5323_v51 }
 0x12e   : > { %3305 = vmatpush3.bf16.msra.mxu1 %v5324_v52  ;;  %3284 = vmatprep.subr.bf16.mxu0 %v5325_v53 }
 0x12f   : > { %3306 = vmatprep.subr.bf16.mxu1 %v5326_v54 }
 0x131   : > { %3285 = vmatpush3.bf16.msra.mxu0 %v5327_v57 }
 0x132   : > { %3307 = vmatpush3.bf16.msra.mxu1 %v5328_v60  ;;  %3286 = vmatprep.subr.bf16.mxu0 %v5329_v61 }
 0x133   : > { %3308 = vmatprep.subr.bf16.mxu1 %v5330_v62 }
 0x135   : > { %3287 = vmatpush3.bf16.msra.mxu0 %v5333_v22 }
 0x136   : > { %3309 = vmatpush3.bf16.msra.mxu1 %v4709_v21  ;;  %3288 = vmatprep.subr.bf16.mxu0 %v5336_v1 }
 0x137   : > { %3310 = vmatprep.subr.bf16.mxu1 %v4719_v23 }
 0x139   : > { %3289 = vmatpush3.bf16.msra.mxu0 %v4723_v19 }
 0x13a   : > { %3311 = vmatpush3.bf16.msra.mxu1 %v4729_v18 }
 0x13c   : > { %1971 = vmatmul.mubr.bf16.vlgmr.msra.gmra.mxu0 %v493_v26 }
 0x13d   : > { %2012 = vmatmul.mubr.bf16.vlgmr.msra.gmra.mxu1 %v495_v3 }
 0x15c   : > { %v3070_v4 = vpop.f32.mrf.mxu0 }
 0x15d   : > { %v3092_v6 = vpop.f32.mrf.mxu1 }
 0x15e   : > { %v3071_v9 = vpop.f32.mrf.mxu0 }
 0x15f   : > { %v3093_v11 = vpop.f32.mrf.mxu1  ;;  %v3072_v37 = vadd.f32 %v3071_v9, %v3070_v4 }
 0x160   : > { %v3073_v12 = vpop.f32.mrf.mxu0  ;;  %v3094_v38 = vadd.f32 %v3093_v11, %v3092_v6 }
 0x161   : > { %v3095_v14 = vpop.f32.mrf.mxu1 }
 0x162   : > { %v3074_v35 = vpop.f32.mrf.mxu0  ;;  %v1220_v46 = vadd.f32 %v3094_v38, %v3072_v37 }
 0x163   : > { %v3096_v21 = vpop.f32.mrf.mxu1  ;;  %v3075_v47 = vadd.f32 %v3074_v35, %v3073_v12 }
 0x164   : > { %v3097_v48 = vadd.f32 %v3096_v21, %v3095_v14 }
 0x166   : > { %v1223_v57 = vadd.f32 %v3097_v48, %v3075_v47 }
 0x17c   : > { %v3114_v27 = vpop.f32.mrf.mxu0 }
 0x17d   : > { %v3136_v28 = vpop.f32.mrf.mxu1 }
 0x17e   : > { %v3115_v36 = vpop.f32.mrf.mxu0 }
 0x17f   : > { %v3137_v23 = vpop.f32.mrf.mxu1  ;;  %v3116_v43 = vadd.f32 %v3115_v36, %v3114_v27 }
 0x180   : > { %v3117_v29 = vpop.f32.mrf.mxu0  ;;  %v3138_v52 = vadd.f32 %v3137_v23, %v3136_v28 }
 0x181   : > { %v3139_v0 = vpop.f32.mrf.mxu1  ;;  %v1261_v51 = vadd.f32 %v3116_v43, %v1220_v46 }
 0x182   : > { %v3118_v19 = vpop.f32.mrf.mxu0 }
 0x183   : > { %v3140_v8 = vpop.f32.mrf.mxu1  ;;  %v3119_v54 = vadd.f32 %v3118_v19, %v3117_v29  ;;  %v1302_v58 = vadd.f32 %v3138_v52, %v1261_v51 }
 0x184   : > { %v3141_v16 = vadd.f32 %v3140_v8, %v3139_v0 }
 0x185   : > { %v1264_v60 = vadd.f32 %v3119_v54, %v1223_v57 }
 0x187   : > { %v1305_v24 = vadd.f32 %v3141_v16, %v1264_v60 }
 0x19c   : > { %v3158_v39 = vpop.f32.mrf.mxu0 }
 0x19d   : > { %v3180_v18 = vpop.f32.mrf.mxu1 }
 0x19e   : > { %v3159_v30 = vpop.f32.mrf.mxu0 }
 0x19f   : > { %v3181_v41 = vpop.f32.mrf.mxu1  ;;  %v3160_v56 = vadd.f32 %v3159_v30, %v3158_v39 }
 0x1a0   : > { %v3161_v2 = vpop.f32.mrf.mxu0  ;;  %v3182_v63 = vadd.f32 %v3181_v41, %v3180_v18 }
 0x1a1   : > { %v3183_v10 = vpop.f32.mrf.mxu1  ;;  %v1727_v62 = vadd.f32 %v3160_v56, %v1302_v58 }
 0x1a2   : > { %v3162_v31 = vpop.f32.mrf.mxu0 }
 0x1a3   : > { %v3184_v32 = vpop.f32.mrf.mxu1  ;;  %v3163_v17 = vadd.f32 %v3162_v31, %v3161_v2  ;;  %v1768_v1 = vadd.f32 %v3182_v63, %v1727_v62 }
 0x1a4   : > { %v3185_v6 = vadd.f32 %v3184_v32, %v3183_v10  ;;  %v758_v32 = vld [vmem:[#allocation2] sm:$0xff] }
 0x1a5   : > { %v1730_v3 = vadd.f32 %v3163_v17, %v1305_v24 }
 0x1a7   : > { %v1771_v29 = vadd.f32 %v3185_v6, %v1730_v3 }
 0x1bc   : > { %v3202_v5 = vpop.f32.mrf.mxu0 }
 0x1bd   : > { %v3224_v13 = vpop.f32.mrf.mxu1 }
 0x1be   : > { %v3203_v7 = vpop.f32.mrf.mxu0 }
 0x1bf   : > { %v3225_v15 = vpop.f32.mrf.mxu1  ;;  %v3204_v20 = vadd.f32 %v3203_v7, %v3202_v5 }
 0x1c0   : > { %v3205_v33 = vpop.f32.mrf.mxu0  ;;  %v3226_v11 = vadd.f32 %v3225_v15, %v3224_v13 }
 0x1c1   : > { %v3227_v34 = vpop.f32.mrf.mxu1  ;;  %v1809_v9 = vadd.f32 %v3204_v20, %v1768_v1 }
 0x1c2   : > { %v3206_v40 = vpop.f32.mrf.mxu0 }
 0x1c3   : > { %v3228_v42 = vpop.f32.mrf.mxu1  ;;  %v3207_v12 = vadd.f32 %v3206_v40, %v3205_v33  ;;  %v1850_v39 = vadd.f32 %v3226_v11, %v1809_v9  ;;  %v759_v40 = vld [vmem:[#allocation2 + $0x8] sm:$0xff] }
 0x1c4   : > { %v3229_v5 = vadd.f32 %v3228_v42, %v3227_v34 }
 0x1c5   : > { %v1812_v30 = vadd.f32 %v3207_v12, %v1771_v29 }
 0x1c7   : > { %v1853_v33 = vadd.f32 %v3229_v5, %v1812_v30 }
 0x1dc   : > { %v3246_v44 = vpop.f32.mrf.mxu0 }
 0x1dd   : > { %v3268_v45 = vpop.f32.mrf.mxu1 }
 0x1de   : > { %v3247_v53 = vpop.f32.mrf.mxu0 }
 0x1df   : > { %v3269_v55 = vpop.f32.mrf.mxu1  ;;  %v3248_v25 = vadd.f32 %v3247_v53, %v3246_v44 }
 0x1e0   : > { %v3249_v59 = vpop.f32.mrf.mxu0  ;;  %v3270_v49 = vadd.f32 %v3269_v55, %v3268_v45 }
 0x1e1   : > { %v3271_v61 = vpop.f32.mrf.mxu1 }
 0x1e2   : > { %v3250_v22 = vpop.f32.mrf.mxu0  ;;  %v1932_v35 = vadd.f32 %v3270_v49, %v3248_v25 }
 0x1e3   : > { %v3272_v50 = vpop.f32.mrf.mxu1  ;;  %v3251_v21 = vadd.f32 %v3250_v22, %v3249_v59 }
 0x1e4   : > { %v3273_v27 = vadd.f32 %v3272_v50, %v3271_v61 }
 0x1e6   : > { %v1935_v41 = vadd.f32 %v3273_v27, %v3251_v21 }
 0x1fc   : > { %v3290_v26 = vpop.f32.mrf.mxu0 }
 0x1fd   : > { %v3312_v4 = vpop.f32.mrf.mxu1 }
 0x1fe   : > { %v3291_v14 = vpop.f32.mrf.mxu0 }
 0x1ff   : > { %v3292_v28 = vadd.f32 %v3291_v14, %v3290_v26  ;;  %v3313_v36 = vpop.f32.mrf.mxu1 }
 0x200   : > { %v3293_v23 = vpop.f32.mrf.mxu0  ;;  %v3314_v19 = vadd.f32 %v3313_v36, %v3312_v4 }
 0x201   : > { %v1973_v0 = vadd.f32 %v3292_v28, %v1932_v35  ;;  %v3315_v8 = vpop.f32.mrf.mxu1 }
 0x202   : > { %v3294_v18 = vpop.f32.mrf.mxu0 }
 0x203   : > { %v2014_v2 = vadd.f32 %v3314_v19, %v1973_v0  ;;  %v3295_v10 = vadd.f32 %v3294_v18, %v3293_v23  ;;  %v3316_v31 = vpop.f32.mrf.mxu1 }
 0x204   : > { %v3317_v15 = vadd.f32 %v3316_v31, %v3315_v8 }
 0x205   : > { %v2020_v13 = vadd.f32 %v2014_v2, %v1850_v39  ;;  %v1976_v7 = vadd.f32 %v3295_v10, %v1935_v41 }
 0x207   : > { %v2022_v37 = vadd.f32 %v2020_v13, %v758_v32  ;;  %v2017_v38 = vadd.f32 %v3317_v15, %v1976_v7 }
 0x209   : > { %2024 = vst [vmem:[#allocation2] sm:$0xff] %v2022_v37  ;;  %v2021_v43 = vadd.f32 %v2017_v38, %v1853_v33  ;;  %2029 = sbr.rel (%p3042_p5) target bundleno = 852 (0x354), region = 72 }
 0x20b   : > { %v2023_v44 = vadd.f32 %v2021_v43, %v759_v40 }
 0x20d   : > { %2025 = vst [vmem:[#allocation2 + $0x8] sm:$0xff] %v2023_v44 }
 0x20e   : > { %v2058_v45 = vld [vmem:[#allocation9 + $0x78] sm:$0xff]  ;;  %v2057_v46 = vld [vmem:[#allocation9 + $0x70] sm:$0xff]  ;;  %v2056_v47 = vld [vmem:[#allocation9 + $0x68] sm:$0xff] }
 0x20f   : > { %v4826_v48 = vand.u32 4294901760, %v2058_v45  ;;  %v4828_v34 = vand.u32 4294901760, %v2057_v46  ;;  %v4830_v42 = vand.u32 4294901760, %v2056_v47  ;;  %v2055_v51 = vld [vmem:[#allocation9 + $0x60] sm:$0xff]  ;;  %v2054_v52 = vld [vmem:[#allocation9 + $0x58] sm:$0xff]  ;;  %v2053_v53 = vld [vmem:[#allocation9 + $0x50] sm:$0xff] }
 0x210   : > { %v4832_v54 = vand.u32 4294901760, %v2055_v51  ;;  %v4834_v55 = vand.u32 4294901760, %v2054_v52  ;;  %v4836_v56 = vand.u32 4294901760, %v2053_v53  ;;  %v2052_v57 = vld [vmem:[#allocation9 + $0x48] sm:$0xff]  ;;  %v2051_v58 = vld [vmem:[#allocation9 + $0x40] sm:$0xff]  ;;  %v2050_v63 = vld [vmem:[#allocation9 + $0x38] sm:$0xff] }
 0x211   : > { %3426 = vmatprep.subr.mxu0 %v4826_v48  ;;  %v4840_v59 = vsub.f32 %v2058_v45, %v4826_v48  ;;  %v4843_v60 = vsub.f32 %v2057_v46, %v4828_v34  ;;  %v4845_v61 = vand.u32 4294901760, %v2052_v57  ;;  %v4848_v62 = vsub.f32 %v2056_v47, %v4830_v42  ;;  %v2049_v26 = vld [vmem:[#allocation9 + $0x30] sm:$0xff]  ;;  %v2048_v14 = vld [vmem:[#allocation9 + $0x28] sm:$0xff]  ;;  %v2047_v29 = vld [vmem:[#allocation9 + $0x20] sm:$0xff] }
 0x212   : > { %3427 = vmatpush3.msra.mxu0 %v4826_v48  ;;  %v4852_v16 = vsub.f32 %v2055_v51, %v4832_v54  ;;  %v4855_v17 = vsub.f32 %v2054_v52, %v4834_v55  ;;  %v4867_v25 = vand.u32 4294901760, %v2051_v58  ;;  %v4873_v50 = vand.u32 4294901760, %v2050_v63  ;;  %v2030_v18 = vld [vmem:[#allocation2] sm:$0xff]  ;;  %v2046_v2 = vld [vmem:[#allocation9 + $0x18] sm:$0xff]  ;;  %v2044_v52 = vld [vmem:[#allocation9 + $0x8] sm:$0xff] }
 0x213   : > { %3428 = vmatprep.subr.mxu0 %v4828_v34  ;;  %v4859_v20 = vand.u32 4294901760, %v4840_v59  ;;  %v4862_v22 = vand.u32 4294901760, %v4843_v60  ;;  %v4865_v24 = vand.u32 4294901760, %v4848_v62  ;;  %v4879_v3 = vsub.f32 %v2053_v53, %v4836_v56  ;;  %v3043_v30 = vld [vmem:[%s5231_s3] ss:$0 sm:$0xff] }
 0x214   : > { %3429 = vmatpush3.msra.mxu0 %v4828_v34  ;;  %v4871_v49 = vand.u32 4294901760, %v4852_v16  ;;  %v4876_v1 = vand.u32 4294901760, %v4855_v17  ;;  %v4889_v11 = vsub.f32 %v2052_v57, %v4845_v61  ;;  %v4898_v28 = vand.u32 4294901760, %v2049_v26  ;;  %v2031_v10 = vld [vmem:[#allocation2 + $0x8] sm:$0xff]  ;;  %v2045_v40 = vld [vmem:[#allocation9 + $0x10] sm:$0xff] }
 0x215   : > { %3430 = vmatprep.subr.mxu0 %v4830_v42  ;;  %v2171_v4 = vsub.f32 %v4840_v59, %v4859_v20  ;;  %v2178_v6 = vsub.f32 %v4843_v60, %v4862_v22  ;;  %v2185_v9 = vsub.f32 %v4848_v62, %v4865_v24  ;;  %v4893_v12 = vand.u32 4294901760, %v4879_v3 }
 0x216   : > { %3431 = vmatpush3.msra.mxu0 %v4830_v42  ;;  %v2192_v27 = vsub.f32 %v4852_v16, %v4871_v49  ;;  %v2199_v36 = vsub.f32 %v4855_v17, %v4876_v1  ;;  %v4904_v23 = vand.u32 4294901760, %v4889_v11  ;;  %v4907_v0 = vsub.f32 %v2051_v58, %v4867_v25 }
 0x217   : > { %3432 = vmatprep.subr.mxu0 %v4832_v54  ;;  %v2172_v35 = vand.u32 4294901760, %v2171_v4  ;;  %v2179_v21 = vand.u32 4294901760, %v2178_v6  ;;  %v2186_v19 = vand.u32 4294901760, %v2185_v9  ;;  %v4910_v8 = vand.u32 4294901760, %v2048_v14  ;;  %v2043_v9 = vld [vmem:[#allocation9] sm:$0xff] }
 0x218   : > { %3433 = vmatpush3.msra.mxu0 %v4832_v54  ;;  %v4913_v39 = vsub.f32 %v2050_v63, %v4873_v50  ;;  %v2206_v41 = vsub.f32 %v4879_v3, %v4893_v12  ;;  %v2193_v31 = vand.u32 4294901760, %v2192_v27  ;;  %v4922_v32 = vand.u32 4294901760, %v2047_v29 }
 0x219   : > { %3434 = vmatprep.subr.mxu0 %v4834_v55  ;;  %3461 = vmatprep.subr.mxu1 %v2172_v35  ;;  %v4925_v5 = vand.u32 4294901760, %v4907_v0  ;;  %v4928_v13 = vsub.f32 %v2049_v26, %v4898_v28  ;;  %v2200_v7 = vand.u32 4294901760, %v2199_v36  ;;  %v2213_v15 = vsub.f32 %v4889_v11, %v4904_v23 }
 0x21a   : > { %3435 = vmatpush3.msra.mxu0 %v4834_v55  ;;  %3462 = vmatpush3.msra.mxu1 %v2172_v35  ;;  %v2039_v33 = vadd.f32 %v3043_v30, %v2030_v18  ;;  %v4934_v37 = vand.u32 4294901760, %v2046_v2  ;;  %v4937_v38 = vand.u32 4294901760, %v4913_v39  ;;  %v4940_v43 = vsub.f32 %v2048_v14, %v4910_v8 }
 0x21b   : > { %3436 = vmatprep.subr.mxu0 %v4836_v56  ;;  %3463 = vmatprep.subr.mxu1 %v2179_v21  ;;  %v2040_v44 = vadd.f32 %v3043_v30, %v2031_v10  ;;  %v2207_v45 = vand.u32 4294901760, %v2206_v41  ;;  %v2220_v47 = vsub.f32 %v4907_v0, %v4925_v5  ;;  %v4947_v51 = vand.u32 4294901760, %v4928_v13 }
 0x21c   : > { %3437 = vmatpush3.msra.mxu0 %v4836_v56  ;;  %3464 = vmatpush3.msra.mxu1 %v2179_v21  ;;  %v2041_v46 = vmax.f32 %v2039_v33, 0.0  ;;  %v4950_v53 = vsub.f32 %v2047_v29, %v4922_v32  ;;  %v2214_v58 = vand.u32 4294901760, %v2213_v15  ;;  %v4953_v63 = vand.u32 4294901760, %v2045_v40 }
 0x21d   : > { %3438 = vmatprep.subr.mxu0 %v4845_v61  ;;  %3465 = vmatprep.subr.mxu1 %v2186_v19  ;;  %v2042_v57 = vmax.f32 %v2040_v44, 0.0  ;;  %v2227_v4 = vsub.f32 %v4913_v39, %v4937_v38  ;;  %v4961_v6 = vand.u32 4294901760, %v4940_v43  ;;  %v4966_v35 = vsub.f32 %v2046_v2, %v4934_v37 }
 0x21e   : > { %3439 = vmatpush3.msra.mxu0 %v4845_v61  ;;  %3466 = vmatpush3.msra.mxu1 %v2186_v19  ;;  %v4955_v26 = vand.u32 4294901760, %v2041_v46  ;;  %v4969_v21 = vand.u32 4294901760, %v2044_v52  ;;  %v2221_v36 = vand.u32 4294901760, %v2220_v47  ;;  %v2234_v29 = vsub.f32 %v4928_v13, %v4947_v51 }
 0x21f   : > { %3440 = vmatprep.subr.mxu0 %v4867_v25  ;;  %3467 = vmatprep.subr.mxu1 %v2193_v31  ;;  %v4963_v14 = vand.u32 4294901760, %v2042_v57  ;;  %v4978_v19 = vand.u32 4294901760, %v4950_v53  ;;  %v4984_v30 = vand.u32 4294901760, %v2043_v9  ;;  %v4987_v41 = vsub.f32 %v2045_v40, %v4953_v63 }
 0x220   : > { %3441 = vmatpush3.msra.mxu0 %v4867_v25  ;;  %3468 = vmatpush3.msra.mxu1 %v2193_v31  ;;  %v4972_v27 = vsub.f32 %v2041_v46, %v4955_v26  ;;  %v2228_v2 = vand.u32 4294901760, %v2227_v4  ;;  %v2241_v10 = vsub.f32 %v4940_v43, %v4961_v6  ;;  %v4999_v33 = vsub.f32 %v2044_v52, %v4969_v21 }
 0x221   : > { %3442 = vmatprep.subr.mxu0 %v4873_v50  ;;  %3469 = vmatprep.subr.mxu1 %v2200_v7  ;;  %v4981_v18 = vsub.f32 %v2042_v57, %v4963_v14  ;;  %v2235_v40 = vand.u32 4294901760, %v2234_v29  ;;  %v2248_v44 = vsub.f32 %v4950_v53, %v4978_v19  ;;  %v5009_v46 = vsub.f32 %v2043_v9, %v4984_v30 }
 0x222   : > { %3443 = vmatpush3.msra.mxu0 %v4873_v50  ;;  %3470 = vmatpush3.msra.mxu1 %v2200_v7  ;;  %v5269_v31 = vand.u32 4294901760, %v4972_v27  ;;  %v4994_v7 = vand.u32 4294901760, %v4966_v35  ;;  %v2242_v47 = vand.u32 4294901760, %v2241_v10  ;;  %v5022_v4 = vand.u32 4294901760, %v4999_v33 }
 0x223   : > { %3444 = vmatprep.subr.mxu0 %v4898_v28  ;;  %3471 = vmatprep.subr.mxu1 %v2207_v45  ;;  %v5268_v15 = vand.u32 4294901760, %v4981_v18  ;;  %v2249_v9 = vand.u32 4294901760, %v2248_v44  ;;  %v5029_v29 = vand.u32 4294901760, %v5009_v46 }
 0x224   : > { %3445 = vmatpush3.msra.mxu0 %v4898_v28  ;;  %3472 = vmatpush3.msra.mxu1 %v2207_v45  ;;  %v5006_v45 = vand.u32 4294901760, %v4987_v41  ;;  %v2150_v52 = vsub.f32 %v4972_v27, %v5269_v31  ;;  %v2255_v57 = vsub.f32 %v4966_v35, %v4994_v7  ;;  %v2269_v44 = vsub.f32 %v4999_v33, %v5022_v4 }
 0x225   : > { %3446 = vmatprep.subr.mxu0 %v4910_v8  ;;  %3473 = vmatprep.subr.mxu1 %v2214_v58  ;;  %v2276_v31 = vsub.f32 %v5009_v46, %v5029_v29 }
 0x226   : > { %3447 = vmatpush3.msra.mxu0 %v4910_v8  ;;  %3474 = vmatpush3.msra.mxu1 %v2214_v58  ;;  %v2160_v58 = vsub.f32 %v4981_v18, %v5268_v15  ;;  %v2256_v10 = vand.u32 4294901760, %v2255_v57 }
 0x227   : > { %3448 = vmatprep.subr.mxu0 %v4922_v32  ;;  %3475 = vmatprep.subr.mxu1 %v2221_v36 }
 0x228   : > { %3449 = vmatpush3.msra.mxu0 %v4922_v32  ;;  %3476 = vmatpush3.msra.mxu1 %v2221_v36  ;;  %v2262_v36 = vsub.f32 %v4987_v41, %v5006_v45  ;;  %v2161_v15 = vand.u32 4294901760, %v2160_v58 }
 0x229   : > { %3450 = vmatprep.subr.mxu0 %v4934_v37  ;;  %3477 = vmatprep.subr.mxu1 %v2228_v2 }
 0x22a   : > { %3451 = vmatpush3.msra.mxu0 %v4934_v37  ;;  %3478 = vmatpush3.msra.mxu1 %v2228_v2  ;;  %v2151_v2 = vand.u32 4294901760, %v2150_v52  ;;  %v2277_v52 = vand.u32 4294901760, %v2276_v31 }
 0x22b   : > { %3452 = vmatprep.subr.mxu0 %v4953_v63  ;;  %3479 = vmatprep.subr.mxu1 %v2235_v40 }
 0x22c   : > { %3453 = vmatpush3.msra.mxu0 %v4953_v63  ;;  %3480 = vmatpush3.msra.mxu1 %v2235_v40  ;;  %v2263_v40 = vand.u32 4294901760, %v2262_v36 }
 0x22d   : > { %3454 = vmatprep.subr.mxu0 %v4969_v21  ;;  %3481 = vmatprep.subr.mxu1 %v2242_v47 }
 0x22e   : > { %3455 = vmatpush3.msra.mxu0 %v4969_v21  ;;  %3482 = vmatpush3.msra.mxu1 %v2242_v47  ;;  %v2270_v47 = vand.u32 4294901760, %v2269_v44 }
 0x22f   : > { %3456 = vmatprep.subr.mxu0 %v4984_v30  ;;  %3483 = vmatprep.subr.mxu1 %v2249_v9 }
 0x230   : > { %3457 = vmatpush3.msra.mxu0 %v4984_v30  ;;  %3484 = vmatpush3.msra.mxu1 %v2249_v9 }
 0x231   : > { %3458 = vmatprep.mubr.f32.mxu0 %v2151_v2  ;;  %3485 = vmatprep.subr.mxu1 %v2256_v10 }
 0x232   : > { %3496 = vmatprep.subr.mxu0 %v4840_v59  ;;  %3459 = vmatmul.mubr.f32.vlgmr.msra.gmra.mxu0 %v2161_v15 }
 0x233   : > { %3486 = vmatpush3.msra.mxu1 %v2256_v10  ;;  %3497 = vmatpush3.msra.mxu0 %v4840_v59  ;;  %v5337_v59 = vand.u32 4294901760, %v4972_v27 }
 0x234   : > { %3487 = vmatprep.subr.mxu1 %v2263_v40  ;;  %3498 = vmatprep.subr.mxu0 %v4843_v60 }
 0x235   : > { %3488 = vmatpush3.msra.mxu1 %v2263_v40  ;;  %3499 = vmatpush3.msra.mxu0 %v4843_v60  ;;  %v5338_v60 = vand.u32 4294901760, %v4981_v18 }
 0x236   : > { %3489 = vmatprep.subr.mxu1 %v2270_v47  ;;  %3500 = vmatprep.subr.mxu0 %v4848_v62 }
 0x237   : > { %3490 = vmatpush3.msra.mxu1 %v2270_v47  ;;  %3501 = vmatpush3.msra.mxu0 %v4848_v62 }
 0x238   : > { %3491 = vmatprep.subr.mxu1 %v2277_v52  ;;  %3502 = vmatprep.subr.mxu0 %v4852_v16 }
 0x239   : > { %3492 = vmatpush3.msra.mxu1 %v2277_v52  ;;  %3493 = vmatprep.mubr.f32.mxu1 %v4955_v26 }
 0x23a   : > { %3503 = vmatpush3.msra.mxu0 %v4852_v16  ;;  %3494 = vmatmul.mubr.f32.vlgmr.msra.gmra.mxu1 %v4963_v14 }
 0x23b   : > { %3504 = vmatprep.subr.mxu0 %v4855_v17  ;;  %3531 = vmatprep.subr.mxu1 %v4826_v48 }
 0x23c   : > { %3505 = vmatpush3.msra.mxu0 %v4855_v17  ;;  %3532 = vmatpush3.msra.mxu1 %v4826_v48 }
 0x23d   : > { %3506 = vmatprep.subr.mxu0 %v4879_v3  ;;  %3533 = vmatprep.subr.mxu1 %v4828_v34 }
 0x23e   : > { %3507 = vmatpush3.msra.mxu0 %v4879_v3  ;;  %3534 = vmatpush3.msra.mxu1 %v4828_v34 }
 0x23f   : > { %3508 = vmatprep.subr.mxu0 %v4889_v11  ;;  %3535 = vmatprep.subr.mxu1 %v4830_v42 }
 0x240   : > { %3509 = vmatpush3.msra.mxu0 %v4889_v11  ;;  %3536 = vmatpush3.msra.mxu1 %v4830_v42 }
 0x241   : > { %3510 = vmatprep.subr.mxu0 %v4907_v0  ;;  %3537 = vmatprep.subr.mxu1 %v4832_v54 }
 0x242   : > { %3511 = vmatpush3.msra.mxu0 %v4907_v0  ;;  %3538 = vmatpush3.msra.mxu1 %v4832_v54 }
 0x243   : > { %3512 = vmatprep.subr.mxu0 %v4913_v39  ;;  %3539 = vmatprep.subr.mxu1 %v4834_v55 }
 0x244   : > { %3513 = vmatpush3.msra.mxu0 %v4913_v39  ;;  %3540 = vmatpush3.msra.mxu1 %v4834_v55 }
 0x245   : > { %3514 = vmatprep.subr.mxu0 %v4928_v13  ;;  %3541 = vmatprep.subr.mxu1 %v4836_v56 }
 0x246   : > { %3515 = vmatpush3.msra.mxu0 %v4928_v13  ;;  %3542 = vmatpush3.msra.mxu1 %v4836_v56 }
 0x247   : > { %3516 = vmatprep.subr.mxu0 %v4940_v43  ;;  %3543 = vmatprep.subr.mxu1 %v4845_v61 }
 0x248   : > { %3517 = vmatpush3.msra.mxu0 %v4940_v43  ;;  %3544 = vmatpush3.msra.mxu1 %v4845_v61 }
 0x249   : > { %3518 = vmatprep.subr.mxu0 %v4950_v53  ;;  %3545 = vmatprep.subr.mxu1 %v4867_v25 }
 0x24a   : > { %3519 = vmatpush3.msra.mxu0 %v4950_v53  ;;  %3546 = vmatpush3.msra.mxu1 %v4867_v25 }
 0x24b   : > { %3520 = vmatprep.subr.mxu0 %v4966_v35  ;;  %3547 = vmatprep.subr.mxu1 %v4873_v50 }
 0x24c   : > { %3521 = vmatpush3.msra.mxu0 %v4966_v35  ;;  %3548 = vmatpush3.msra.mxu1 %v4873_v50 }
 0x24d   : > { %3522 = vmatprep.subr.mxu0 %v4987_v41  ;;  %3549 = vmatprep.subr.mxu1 %v4898_v28 }
 0x24e   : > { %3523 = vmatpush3.msra.mxu0 %v4987_v41  ;;  %3550 = vmatpush3.msra.mxu1 %v4898_v28 }
 0x24f   : > { %3524 = vmatprep.subr.mxu0 %v4999_v33  ;;  %3551 = vmatprep.subr.mxu1 %v4910_v8 }
 0x250   : > { %3525 = vmatpush3.msra.mxu0 %v4999_v33  ;;  %3552 = vmatpush3.msra.mxu1 %v4910_v8 }
 0x251   : > { %3526 = vmatprep.subr.mxu0 %v5009_v46  ;;  %3553 = vmatprep.subr.mxu1 %v4922_v32 }
 0x252   : > { %3527 = vmatpush3.msra.mxu0 %v5009_v46  ;;  %3528 = vmatprep.mubr.f32.mxu0 %v4972_v27 }
 0x253   : > { %3554 = vmatpush3.msra.mxu1 %v4922_v32  ;;  %3529 = vmatmul.mubr.f32.vlgmr.msra.gmra.mxu0 %v4981_v18 }
 0x254   : > { %3555 = vmatprep.subr.mxu1 %v4934_v37  ;;  %3566 = vmatprep.subr.mxu0 %v4859_v20 }
 0x255   : > { %3556 = vmatpush3.msra.mxu1 %v4934_v37  ;;  %3567 = vmatpush3.msra.mxu0 %v4859_v20 }
 0x256   : > { %3557 = vmatprep.subr.mxu1 %v4953_v63  ;;  %3568 = vmatprep.subr.mxu0 %v4862_v22 }
 0x257   : > { %3558 = vmatpush3.msra.mxu1 %v4953_v63  ;;  %3569 = vmatpush3.msra.mxu0 %v4862_v22 }
 0x258   : > { %3559 = vmatprep.subr.mxu1 %v4969_v21  ;;  %3570 = vmatprep.subr.mxu0 %v4865_v24 }
 0x259   : > { %3560 = vmatpush3.msra.mxu1 %v4969_v21  ;;  %3571 = vmatpush3.msra.mxu0 %v4865_v24 }
 0x25a   : > { %3561 = vmatprep.subr.mxu1 %v4984_v30  ;;  %3572 = vmatprep.subr.mxu0 %v4871_v49 }
 0x25b   : > { %3562 = vmatpush3.msra.mxu1 %v4984_v30  ;;  %3563 = vmatprep.mubr.f32.mxu1 %v5337_v59 }
 0x25c   : > { %3573 = vmatpush3.msra.mxu0 %v4871_v49  ;;  %3564 = vmatmul.mubr.f32.vlgmr.msra.gmra.mxu1 %v5338_v60 }
 0x25d   : > { %3574 = vmatprep.subr.mxu0 %v4876_v1  ;;  %3601 = vmatprep.subr.mxu1 %v4826_v48 }
 0x25e   : > { %3575 = vmatpush3.msra.mxu0 %v4876_v1  ;;  %3602 = vmatpush3.msra.mxu1 %v4826_v48 }
 0x25f   : > { %3576 = vmatprep.subr.mxu0 %v4893_v12  ;;  %3603 = vmatprep.subr.mxu1 %v4828_v34 }
 0x260   : > { %3577 = vmatpush3.msra.mxu0 %v4893_v12  ;;  %3604 = vmatpush3.msra.mxu1 %v4828_v34  ;;  %v3044_v34 = vld [vmem:[%s5233_s5] ss:$0 sm:$0xff] }
 0x261   : > { %3578 = vmatprep.subr.mxu0 %v4904_v23  ;;  %3605 = vmatprep.subr.mxu1 %v4830_v42 }
 0x262   : > { %3579 = vmatpush3.msra.mxu0 %v4904_v23  ;;  %3606 = vmatpush3.msra.mxu1 %v4830_v42 }
 0x263   : > { %3580 = vmatprep.subr.mxu0 %v4925_v5  ;;  %3607 = vmatprep.subr.mxu1 %v4832_v54 }
 0x264   : > { %3581 = vmatpush3.msra.mxu0 %v4925_v5  ;;  %3608 = vmatpush3.msra.mxu1 %v4832_v54 }
 0x265   : > { %3582 = vmatprep.subr.mxu0 %v4937_v38  ;;  %3609 = vmatprep.subr.mxu1 %v4834_v55 }
 0x266   : > { %3583 = vmatpush3.msra.mxu0 %v4937_v38  ;;  %3610 = vmatpush3.msra.mxu1 %v4834_v55 }
 0x267   : > { %3584 = vmatprep.subr.mxu0 %v4947_v51  ;;  %3611 = vmatprep.subr.mxu1 %v4836_v56 }
 0x268   : > { %3585 = vmatpush3.msra.mxu0 %v4947_v51  ;;  %3612 = vmatpush3.msra.mxu1 %v4836_v56 }
 0x269   : > { %3586 = vmatprep.subr.mxu0 %v4961_v6  ;;  %3613 = vmatprep.subr.mxu1 %v4845_v61 }
 0x26a   : > { %3587 = vmatpush3.msra.mxu0 %v4961_v6  ;;  %3614 = vmatpush3.msra.mxu1 %v4845_v61 }
 0x26b   : > { %3588 = vmatprep.subr.mxu0 %v4978_v19  ;;  %3615 = vmatprep.subr.mxu1 %v4867_v25 }
 0x26c   : > { %3589 = vmatpush3.msra.mxu0 %v4978_v19  ;;  %3616 = vmatpush3.msra.mxu1 %v4867_v25 }
 0x26d   : > { %3590 = vmatprep.subr.mxu0 %v4994_v7  ;;  %3617 = vmatprep.subr.mxu1 %v4873_v50 }
 0x26e   : > { %3591 = vmatpush3.msra.mxu0 %v4994_v7  ;;  %3618 = vmatpush3.msra.mxu1 %v4873_v50 }
 0x26f   : > { %3592 = vmatprep.subr.mxu0 %v5006_v45  ;;  %3619 = vmatprep.subr.mxu1 %v4898_v28 }
 0x270   : > { %3593 = vmatpush3.msra.mxu0 %v5006_v45  ;;  %3620 = vmatpush3.msra.mxu1 %v4898_v28 }
 0x271   : > { %3594 = vmatprep.subr.mxu0 %v5022_v4  ;;  %3621 = vmatprep.subr.mxu1 %v4910_v8 }
 0x272   : > { %3595 = vmatpush3.msra.mxu0 %v5022_v4  ;;  %3622 = vmatpush3.msra.mxu1 %v4910_v8 }
 0x273   : > { %3596 = vmatprep.subr.mxu0 %v5029_v29  ;;  %3623 = vmatprep.subr.mxu1 %v4922_v32 }
 0x274   : > { %3597 = vmatpush3.msra.mxu0 %v5029_v29  ;;  %3598 = vmatprep.mubr.f32.mxu0 %v4955_v26 }
 0x275   : > { %3624 = vmatpush3.msra.mxu1 %v4922_v32  ;;  %3599 = vmatmul.mubr.f32.vlgmr.msra.gmra.mxu0 %v4963_v14 }
 0x276   : > { %3625 = vmatprep.subr.mxu1 %v4934_v37  ;;  %3633 = vmatprep.mubr.f32.mxu1 %v4955_v26 }
 0x277   : > { %3626 = vmatpush3.msra.mxu1 %v4934_v37 }
 0x278   : > { %3627 = vmatprep.subr.mxu1 %v4953_v63 }
 0x279   : > { %3628 = vmatpush3.msra.mxu1 %v4953_v63 }
 0x27a   : > { %3629 = vmatprep.subr.mxu1 %v4969_v21 }
 0x27b   : > { %3630 = vmatpush3.msra.mxu1 %v4969_v21 }
 0x27c   : > { %3631 = vmatprep.subr.mxu1 %v4984_v30 }
 0x27d   : > { %3632 = vmatpush3.msra.mxu1 %v4984_v30 }
 0x27e   : > { %3634 = vmatmul.mubr.f32.vlgmr.msra.gmra.mxu1 %v4963_v14 }
 0x2f2   : > { %v3460_v48 = vpop.f32.mrf.mxu0 }
 0x2f3   : > { %v2164_v56 = vadd.f32 %v3460_v48, %v3044_v34 }
 0x2f4   : > { %v2153_v42 = vpop.f32.mrf.mxu0 }
 0x2f5   : > { %v2154_v62 = vadd.f32 %v3044_v34, %v2153_v42 }
 0x2fa   : > { %v3495_v54 = vpop.f32.mrf.mxu1 }
 0x2fb   : > { %v2321_v20 = vadd.f32 %v3495_v54, %v2164_v56 }
 0x2fc   : > { %v2314_v61 = vpop.f32.mrf.mxu1 }
 0x2fd   : > { %v2315_v24 = vadd.f32 %v2314_v61, %v2154_v62 }
 0x313   : > { %v3530_v55 = vpop.f32.mrf.mxu0 }
 0x314   : > { %v2432_v25 = vadd.f32 %v3530_v55, %v2321_v20 }
 0x315   : > { %v2424_v16 = vpop.f32.mrf.mxu0 }
 0x316   : > { %v2425_v50 = vadd.f32 %v2424_v16, %v2315_v24 }
 0x31c   : > { %v3565_v17 = vpop.f32.mrf.mxu1 }
 0x31d   : > { %v2529_v1 = vadd.f32 %v3565_v17, %v2432_v25 }
 0x31e   : > { %v2520_v49 = vpop.f32.mrf.mxu1 }
 0x31f   : > { %v2521_v11 = vadd.f32 %v2520_v49, %v2425_v50 }
 0x335   : > { %v3600_v22 = vpop.f32.mrf.mxu0 }
 0x336   : > { %v2654_v12 = vadd.f32 %v3600_v22, %v2529_v1 }
 0x337   : > { %v2647_v3 = vpop.f32.mrf.mxu0 }
 0x338   : > { %v2648_v23 = vadd.f32 %v2647_v3, %v2521_v11 }
 0x33e   : > { %v3635_v28 = vpop.f32.mrf.mxu1 }
 0x33f   : > { %v2747_v0 = vadd.f32 %v3635_v28, %v2654_v12 }
 0x340   : > { %v2740_v8 = vpop.f32.mrf.mxu1 }
 0x341   : > { %3874 = vtanh.f32 %v2747_v0  ;;  %v2741_v39 = vadd.f32 %v2740_v8, %v2648_v23 }
 0x343   : > { %3876 = vtanh.f32 %v2741_v39 }
 0x34e   : > { %v3875_v32 = vpop.eup %3874 }
 0x34f   : > { %v2753_v5 = vmax.f32 %v3875_v32, 0.0 }
 0x350   : > { %v3877_v13 = vpop.eup %3876 }
 0x351   : > { %2755 = vst [vmem:[#allocation12 + $0x8] sm:$0xff] %v2753_v5  ;;  %v2752_v37 = vmax.f32 %v3877_v13, 0.0 }
 0x353   : > { %2754 = vst [vmem:[#allocation12] sm:$0xff] %v2752_v37 }
 0x354 PF: > { %s5339_s16 = sadd.s32 4294967295, %s4098_s29   ;;  %s4110_s23 = smov [#allocation11]  }
 0x355   : > { %p5184_p0 = scmp.eq.s32.totalorder %s5339_s16, 1  ;;  %s2766_s24 = sshll.u32 %s4110_s23, 4  ;;  %s2767_s24 = int_to_ptr.vmem [resolvable:$true] %s2766_s24 }
 0x356   : > { %s3984_s11 = scalar_lea.vmem %s2767_s24, 2048  ;;  %p3991_p10 = scmp.lt.s32.totalorder %s2767_s24, %s2767_s24 }
 0x357   : > { %p3985_p2 = scmp.ne.s32.totalorder %s2767_s24, %s3984_s11  ;;  %p3992_p9 = scmp.lt.s32.totalorder %s3984_s11, %s3984_s11 }
 0x359   : > { %p3986_p7 = pnand %p3985_p2, %p5184_p0  ;;  %p3993_p11 = por %p3992_p9, %p3991_p10 }
 0x35b   : > { %p3987_p6 = pneg %p3986_p7 }
 0x35d   : > { %p3994_p8 = pnand %p3993_p11, %p3987_p6 }
 0x35f   : > { %3997 = shalt.err (!%p3994_p8)
}
 0x360   : > { %s4111_s13 = smov 1024   ;;  %s4112_s22 = smov 64  }
 0x361   : > { %3651 = dma.vmem_to_hbm [thread:$0]  (%p5184_p0), %s2767_s24, 2048, %s5234_s6, [#allocation5], %s4111_s13, %s4111_s13, %s4112_s22  }
 0x362   : > { %s4113_s20 = smov [#allocation12]  }
 0x363   : > { %s2782_s30 = sshll.u32 %s4113_s20, 4  ;;  %s2783_s30 = int_to_ptr.vmem [resolvable:$true] %s2782_s30 }
 0x364   : > { %s4008_s8 = scalar_lea.vmem %s2783_s30, 256  ;;  %p4015_p1 = scmp.lt.s32.totalorder %s2783_s30, %s2783_s30 }
 0x365   : > { %p4009_p12 = scmp.ne.s32.totalorder %s2783_s30, %s4008_s8  ;;  %p4016_p4 = scmp.lt.s32.totalorder %s4008_s8, %s4008_s8 }
 0x367   : > { %p4010_p13 = pnand %p4009_p12, %p5184_p0  ;;  %p4017_p5 = por %p4016_p4, %p4015_p1 }
 0x369   : > { %p4011_p3 = pneg %p4010_p13 }
 0x36b   : > { %p4018_p2 = pnand %p4017_p5, %p4011_p3 }
 0x36d   : > { %4021 = shalt.err (!%p4018_p2)
}
 0x36e   : > { %s4114_s9 = smov 128   ;;  %s4115_s27 = smov 8  }
 0x36f   : > { %3653 = dma.vmem_to_hbm [thread:$0]  (%p5184_p0), %s2783_s30, 256, %s5235_s7, [#allocation13], %s4114_s9, %s4114_s9, %s4115_s27  }
 0x370   : > { %4069 = dma.done.wait (%p5184_p0), [#allocation5], 2048  }
 0x371   : > { %4071 = vsyncadd (%p5184_p0), [#allocation5], 4294965248 }
 0x372   : > { %4073 = dma.done.wait (%p5184_p0), [#allocation13], 256  }
 0x373   : > { %4075 = vsyncadd (%p5184_p0), [#allocation13], 4294967040 }
 0x374 PF: > { %s25_s29 = sadd.s32 1, %s4098_s29   ;;  %s5341_s24 = smov %s4082_s25 }
 0x375   : > { %p22_p7 = scmp.ge.s32.totalorder %s25_s29, 4   ;;  %s5342_s25 = smov %s4086_s26 }
 0x376   : > { %s5343_s26 = smov %s4255_s17  ;;  %s5344_s27 = smov %s4094_s28 }
 0x377   : > { %s5345_s28 = smov %s5347_s21  ;;  %24 = sbr.rel (!%p22_p7) target bundleno = 8 (0x8), region = 117 }
 0x37c   :  { %2802 = vsyncpa [#allocation4], 1 }
 0x37d   :  { %2804 = vsyncpa [#allocation4 + $0x1], 1 }
 0x37e   :  { %2805 = vsyncpa [#allocation7], 1 }
 0x37f   :  { %2806 = vsyncpa [#allocation10], 1 }
 0x380   :  { %2807 = vsyncpa [#allocation5], 1 }
 0x381   :  { %2809 = vsyncpa [#allocation5 + $0x1], 1 }
 0x382   :  { %2810 = vsyncpa [#allocation13], 1 }

</bundles_post_ra>
